<compile_context>
chip_gen: v7x
topology: tpu7x:2x2x1
jax: 0.10.0
libtpu: 0.0.40
codegen_flags: <defaults>
</compile_context>

<pallas_src>
import jax
import jax.numpy as jnp
from jax.experimental import pallas as pl
from jax.experimental.pallas import tpu as pltpu

LANE = 128


def _round_up(v, m):
    return ((v + m - 1) // m) * m


def _gcn_kernel(a_ref, xk_ref, xi_ref, w_rel_ref, w_root_ref, b_rel_ref,
                w_lin_ref, b_lin_ref, o_ref):
    """One grid step = one TM-row strip of nodes, computed straight-line.

    agg = A[rows, :] @ x_bf16                      (bf16 x bf16 MXU, f32 acc)
    h   = relu(agg @ W_rel + x_i @ W_root + b_rel) (GraphConv; lin_root biasless)
    out = h @ W_lin + b_lin                        (Linear head, lane-dense store)
    """
    agg = jnp.dot(a_ref[...], xk_ref[...], preferred_element_type=jnp.float32)
    h = (jnp.dot(agg, w_rel_ref[...], preferred_element_type=jnp.float32)
         + jnp.dot(xi_ref[...], w_root_ref[...], preferred_element_type=jnp.float32)
         + b_rel_ref[...])
    h = jnp.maximum(h, 0.0)
    out = jnp.dot(h, w_lin_ref[...], preferred_element_type=jnp.float32)
    o_ref[...] = (out + b_lin_ref[...]).astype(o_ref.dtype)


def build_adjacency(edge_index, n_padded):
    """Dense aggregation matrix A[dst, src] += 1, built directly in bf16.

    Edge multiplicities are exact in bf16 up to 256 duplicate edges per pair.
    TODO(synk): replace with a CSR scalar-prefetch gather for large sparse graphs.
    """
    src, dst = edge_index[0], edge_index[1]
    ones = jnp.ones(src.shape, jnp.bfloat16)
    return jnp.zeros((n_padded, n_padded), jnp.bfloat16).at[dst, src].add(ones)


def gcn_forward(x, edge_index, params, *, tm=320):
    """x: [N, F] float32, edge_index: [2, E] int32 (row 0 = src, row 1 = dst)."""
    N, F = x.shape
    w_rel, b_rel, w_root, w_lin, b_lin = params
    H = w_rel.shape[1]
    O = w_lin.shape[1]

    FP = HP = OP = LANE
    assert F <= FP and H <= HP and O <= OP, "pad constants assume small dims"
    assert tm % 8 == 0, "row tile must be sublane-aligned"
    Np = _round_up(N, tm)

    # Adjacency in bf16 (hot-path candidate for hoisting / CSR replacement).
    A = build_adjacency(edge_index, Np)

    # Zero-pad node features and all weights to 128-lane-friendly shapes.
    xp = jnp.zeros((Np, FP), jnp.float32).at[:N, :F].set(x)
    xk_bf16 = xp.astype(jnp.bfloat16)          # neighbour operand (MXU bf16 path)
    w_rel_p = jnp.zeros((FP, HP), jnp.float32).at[:F, :H].set(w_rel)
    w_root_p = jnp.zeros((FP, HP), jnp.float32).at[:F, :H].set(w_root)
    b_rel_p = jnp.zeros((1, HP), jnp.float32).at[0, :H].set(b_rel)
    w_lin_p = jnp.zeros((HP, OP), jnp.float32).at[:H, :O].set(w_lin)
    b_lin_p = jnp.zeros((1, OP), jnp.float32).at[0, :O].set(b_lin)

    grid = (Np // tm,)   # single "parallel" row-tile axis (even count for v7x)

    out_padded = pl.pallas_call(
        _gcn_kernel,
        out_shape=jax.ShapeDtypeStruct((Np, OP), jnp.float32),
        grid_spec=pltpu.PrefetchScalarGridSpec(
            num_scalar_prefetch=0,
            grid=grid,
            in_specs=[
                pl.BlockSpec((tm, Np), lambda i: (i, 0)),     # A row strip (bf16)
                pl.BlockSpec((Np, FP), lambda i: (0, 0)),     # x neighbours (bf16, resident)
                pl.BlockSpec((tm, FP), lambda i: (i, 0)),     # x_i root term (f32)
                pl.BlockSpec((FP, HP), lambda i: (0, 0)),     # W_rel
                pl.BlockSpec((FP, HP), lambda i: (0, 0)),     # W_root
                pl.BlockSpec((1, HP), lambda i: (0, 0)),      # b_rel
                pl.BlockSpec((HP, OP), lambda i: (0, 0)),     # W_lin
                pl.BlockSpec((1, OP), lambda i: (0, 0)),      # b_lin
            ],
            out_specs=pl.BlockSpec((tm, OP), lambda i: (i, 0)),
        ),
        compiler_params=pltpu.CompilerParams(
            dimension_semantics=("parallel",),
            vmem_limit_bytes=8 * 1024 * 1024,   # ~2 MiB actually used
        ),
    )(A, xk_bf16, xp, w_rel_p, w_root_p, b_rel_p, w_lin_p, b_lin_p)

    return out_padded[:N, :O]


def init_params(key, n_features, hidden_channels, n_outputs):
    """Deterministic synthetic parameters (shapes match the PyTorch module)."""
    k1, k2, k3, k4, k5 = jax.random.split(key, 5)
    scale1 = 1.0 / jnp.sqrt(n_features)
    scale2 = 1.0 / jnp.sqrt(hidden_channels)
    # Stored as [in, out] (transposed relative to torch Linear.weight).
    w_rel = jax.random.uniform(k1, (n_features, hidden_channels),
                               minval=-scale1, maxval=scale1, dtype=jnp.float32)
    b_rel = jax.random.uniform(k2, (hidden_channels,),
                               minval=-scale1, maxval=scale1, dtype=jnp.float32)
    w_root = jax.random.uniform(k3, (n_features, hidden_channels),
                                minval=-scale1, maxval=scale1, dtype=jnp.float32)
    w_lin = jax.random.uniform(k4, (hidden_channels, n_outputs * 3),
                               minval=-scale2, maxval=scale2, dtype=jnp.float32)
    b_lin = jax.random.uniform(k5, (n_outputs * 3,),
                               minval=-scale2, maxval=scale2, dtype=jnp.float32)
    return (w_rel, b_rel, w_root, w_lin, b_lin)


def gcn_reference(x, edge_index, params, *, bf16_neighbors=False):
    """Pure-JAX reference.  With bf16_neighbors=True the neighbour operand is
    rounded to bf16 to match the kernel's bf16 MXU aggregation exactly."""
    w_rel, b_rel, w_root, w_lin, b_lin = params
    src, dst = edge_index[0], edge_index[1]
    xn = x.astype(jnp.bfloat16).astype(jnp.float32) if bf16_neighbors else x
    agg = jnp.zeros_like(x).at[dst].add(xn[src])
    hp = jax.lax.Precision.HIGHEST
    h = jnp.dot(agg, w_rel, precision=hp) + b_rel + jnp.dot(x, w_root, precision=hp)
    h = jnp.maximum(h, 0.0)
    return jnp.dot(h, w_lin, precision=hp) + b_lin


if __name__ == "__main__":
    # Small but non-degenerate problem: N=600 pads to Np=640 with TM=320,
    # giving a 2-step parallel grid (balanced across v7x's two TensorCores).
    N_NODES = 600
    N_FEATURES = 16
    HIDDEN = 32
    N_OUTPUTS = 4
    N_EDGES = 4096

    key = jax.random.PRNGKey(0)
    k_x, k_e, k_p = jax.random.split(key, 3)

    x = jax.random.normal(k_x, (N_NODES, N_FEATURES), dtype=jnp.float32)
    edge_index = jax.random.randint(k_e, (2, N_EDGES), 0, N_NODES, dtype=jnp.int32)
    params = init_params(k_p, N_FEATURES, HIDDEN, N_OUTPUTS)

    out = jax.block_until_ready(gcn_forward(x, edge_index, params))
    assert out.shape == (N_NODES, N_OUTPUTS * 3)

    # Tight check vs. a reference that matches the kernel's bf16 neighbour
    # operand; loose check vs. the exact f32 reference (bf16 rounding of x
    # contributes ~0.4% relative error through the aggregation).
    ref_bf16 = gcn_reference(x, edge_index, params, bf16_neighbors=True)
    ref_f32 = gcn_reference(x, edge_index, params, bf16_neighbors=False)
    err_bf16 = jnp.max(jnp.abs(out - ref_bf16))
    err_f32 = jnp.max(jnp.abs(out - ref_f32))
    assert jnp.allclose(out, ref_bf16, atol=2e-3, rtol=2e-3), (
        f"mismatch vs bf16-aggregated reference, max abs err {err_bf16}")
    assert jnp.allclose(out, ref_f32, atol=5e-2, rtol=5e-2), (
        f"mismatch vs f32 reference, max abs err {err_f32}")

    print("KERNEL_OK")
</pallas_src>

<mosaic_0001>
module attributes {stable_mosaic.version = 11 : i64} {
  func.func @_gcn_kernel(%arg0: i32, %arg1: memref<320x640xbf16, #tpu.memory_space<vmem>>, %arg2: memref<640x128xbf16, #tpu.memory_space<vmem>>, %arg3: memref<320x128xf32, #tpu.memory_space<vmem>>, %arg4: memref<128x128xf32, #tpu.memory_space<vmem>>, %arg5: memref<128x128xf32, #tpu.memory_space<vmem>>, %arg6: memref<1x128xf32, #tpu.memory_space<vmem>>, %arg7: memref<128x128xf32, #tpu.memory_space<vmem>>, %arg8: memref<1x128xf32, #tpu.memory_space<vmem>>, %arg9: memref<320x128xf32, #tpu.memory_space<vmem>>) attributes {dimension_semantics = [#tpu.dimension_semantics<parallel>], iteration_bounds = array<i64: 2>, scalar_prefetch = 0 : i64, scratch_operands = 0 : i64, tpu.core_type = #tpu.core_type<tc>, window_params = [{transform_indices = @transform_0, window_bounds = array<i64: 320, 640>}, {pipeline_mode = #tpu.pipeline_mode<synchronous>, transform_indices = @transform_1, window_bounds = array<i64: 640, 128>}, {transform_indices = @transform_2, window_bounds = array<i64: 320, 128>}, {pipeline_mode = #tpu.pipeline_mode<synchronous>, transform_indices = @transform_3, window_bounds = array<i64: 128, 128>}, {pipeline_mode = #tpu.pipeline_mode<synchronous>, transform_indices = @transform_4, window_bounds = array<i64: 128, 128>}, {pipeline_mode = #tpu.pipeline_mode<synchronous>, transform_indices = @transform_5, window_bounds = array<i64: 1, 128>}, {pipeline_mode = #tpu.pipeline_mode<synchronous>, transform_indices = @transform_6, window_bounds = array<i64: 128, 128>}, {pipeline_mode = #tpu.pipeline_mode<synchronous>, transform_indices = @transform_7, window_bounds = array<i64: 1, 128>}, {transform_indices = @transform_8, window_bounds = array<i64: 320, 128>}]} {
    %c0 = arith.constant 0 : index
    %c0_0 = arith.constant 0 : index
    %0 = vector.load %arg1[%c0, %c0_0] : memref<320x640xbf16, #tpu.memory_space<vmem>>, vector<320x640xbf16>
    %c0_1 = arith.constant 0 : index
    %c0_2 = arith.constant 0 : index
    %1 = vector.load %arg2[%c0_1, %c0_2] : memref<640x128xbf16, #tpu.memory_space<vmem>>, vector<640x128xbf16>
    %cst = arith.constant dense<0.000000e+00> : vector<320x128xf32>
    %2 = tpu.matmul %0, %1, %cst {dimension_numbers = #tpu.dot_dimension_numbers<[1], [0], [0], [1], [0, 0, 1, 1], [], []>} : vector<320x640xbf16>, vector<640x128xbf16>, vector<320x128xf32> -> vector<320x128xf32>
    %c0_3 = arith.constant 0 : index
    %c0_4 = arith.constant 0 : index
    %3 = vector.load %arg4[%c0_3, %c0_4] : memref<128x128xf32, #tpu.memory_space<vmem>>, vector<128x128xf32>
    %cst_5 = arith.constant dense<0.000000e+00> : vector<320x128xf32>
    %4 = tpu.matmul %2, %3, %cst_5 {dimension_numbers = #tpu.dot_dimension_numbers<[1], [0], [0], [1], [0, 0, 1, 1], [], []>} : vector<320x128xf32>, vector<128x128xf32>, vector<320x128xf32> -> vector<320x128xf32>
    %c0_6 = arith.constant 0 : index
    %c0_7 = arith.constant 0 : index
    %5 = vector.load %arg3[%c0_6, %c0_7] : memref<320x128xf32, #tpu.memory_space<vmem>>, vector<320x128xf32>
    %c0_8 = arith.constant 0 : index
    %c0_9 = arith.constant 0 : index
    %6 = vector.load %arg5[%c0_8, %c0_9] : memref<128x128xf32, #tpu.memory_space<vmem>>, vector<128x128xf32>
    %cst_10 = arith.constant dense<0.000000e+00> : vector<320x128xf32>
    %7 = tpu.matmul %5, %6, %cst_10 {dimension_numbers = #tpu.dot_dimension_numbers<[1], [0], [0], [1], [0, 0, 1, 1], [], []>} : vector<320x128xf32>, vector<128x128xf32>, vector<320x128xf32> -> vector<320x128xf32>
    %8 = arith.addf %4, %7 : vector<320x128xf32>
    %c0_11 = arith.constant 0 : index
    %c0_12 = arith.constant 0 : index
    %9 = vector.load %arg6[%c0_11, %c0_12] : memref<1x128xf32, #tpu.memory_space<vmem>>, vector<1x128xf32>
    %10 = vector.broadcast %9 : vector<1x128xf32> to vector<320x128xf32>
    %11 = arith.addf %8, %10 : vector<320x128xf32>
    %cst_13 = arith.constant 0.000000e+00 : f32
    %12 = vector.broadcast %cst_13 : f32 to vector<320x128xf32>
    %13 = arith.maximumf %11, %12 : vector<320x128xf32>
    %c0_14 = arith.constant 0 : index
    %c0_15 = arith.constant 0 : index
    %14 = vector.load %arg7[%c0_14, %c0_15] : memref<128x128xf32, #tpu.memory_space<vmem>>, vector<128x128xf32>
    %cst_16 = arith.constant dense<0.000000e+00> : vector<320x128xf32>
    %15 = tpu.matmul %13, %14, %cst_16 {dimension_numbers = #tpu.dot_dimension_numbers<[1], [0], [0], [1], [0, 0, 1, 1], [], []>} : vector<320x128xf32>, vector<128x128xf32>, vector<320x128xf32> -> vector<320x128xf32>
    %c0_17 = arith.constant 0 : index
    %c0_18 = arith.constant 0 : index
    %16 = vector.load %arg8[%c0_17, %c0_18] : memref<1x128xf32, #tpu.memory_space<vmem>>, vector<1x128xf32>
    %17 = vector.broadcast %16 : vector<1x128xf32> to vector<320x128xf32>
    %18 = arith.addf %15, %17 : vector<320x128xf32>
    %c0_19 = arith.constant 0 : index
    %c0_20 = arith.constant 0 : index
    %19 = vector.load %arg9[%c0_19, %c0_20] : memref<320x128xf32, #tpu.memory_space<vmem>>, vector<320x128xf32>
    tpu.vector_store %arg9[%c0_19, %c0_20], %18 {strides = array<i32>} : memref<320x128xf32, #tpu.memory_space<vmem>>, vector<320x128xf32>,
    return
  }
  func.func @transform_0(%arg0: i32) -> (i32, i32) {
    %c0_i32 = arith.constant 0 : i32
    %c0_i32_0 = arith.constant 0 : i32
    return %arg0, %c0_i32 : i32, i32
  }
  func.func @transform_1(%arg0: i32) -> (i32, i32) {
    %c0_i32 = arith.constant 0 : i32
    %c0_i32_0 = arith.constant 0 : i32
    %c0_i32_1 = arith.constant 0 : i32
    return %c0_i32, %c0_i32_0 : i32, i32
  }
  func.func @transform_2(%arg0: i32) -> (i32, i32) {
    %c0_i32 = arith.constant 0 : i32
    %c0_i32_0 = arith.constant 0 : i32
    return %arg0, %c0_i32 : i32, i32
  }
  func.func @transform_3(%arg0: i32) -> (i32, i32) {
    %c0_i32 = arith.constant 0 : i32
    %c0_i32_0 = arith.constant 0 : i32
    %c0_i32_1 = arith.constant 0 : i32
    return %c0_i32, %c0_i32_0 : i32, i32
  }
  func.func @transform_4(%arg0: i32) -> (i32, i32) {
    %c0_i32 = arith.constant 0 : i32
    %c0_i32_0 = arith.constant 0 : i32
    %c0_i32_1 = arith.constant 0 : i32
    return %c0_i32, %c0_i32_0 : i32, i32
  }
  func.func @transform_5(%arg0: i32) -> (i32, i32) {
    %c0_i32 = arith.constant 0 : i32
    %c0_i32_0 = arith.constant 0 : i32
    %c0_i32_1 = arith.constant 0 : i32
    return %c0_i32, %c0_i32_0 : i32, i32
  }
  func.func @transform_6(%arg0: i32) -> (i32, i32) {
    %c0_i32 = arith.constant 0 : i32
    %c0_i32_0 = arith.constant 0 : i32
    %c0_i32_1 = arith.constant 0 : i32
    return %c0_i32, %c0_i32_0 : i32, i32
  }
  func.func @transform_7(%arg0: i32) -> (i32, i32) {
    %c0_i32 = arith.constant 0 : i32
    %c0_i32_0 = arith.constant 0 : i32
    %c0_i32_1 = arith.constant 0 : i32
    return %c0_i32, %c0_i32_0 : i32, i32
  }
  func.func @transform_8(%arg0: i32) -> (i32, i32) {
    %c0_i32 = arith.constant 0 : i32
    %c0_i32_0 = arith.constant 0 : i32
    return %arg0, %c0_i32 : i32, i32
  }
}

</mosaic_0001>

<bundles_post_ra>
// kernel: tpu_custom_call.1
= control target key start
LH: loop header
LB: loop body
LE: loop exit
PB: predicated region body
PF: predicated region fallthrough
CT: control target
= control target key end

     0   :  { %s5384_s0 = inlined_call_operand.hbm [shape: bf16[640,640], index: 0, kind: input, shape index: {}]   ;;  %s5385_s1 = inlined_call_operand.hbm [shape: bf16[640,128], index: 1, kind: input, shape index: {}]   ;;  %s5386_s2 = inlined_call_operand.hbm [shape: f32[640,128], index: 2, kind: input, shape index: {}]   ;;  %s5387_s3 = inlined_call_operand.hbm [shape: f32[128,128], index: 3, kind: input, shape index: {}]   ;;  %s5388_s4 = inlined_call_operand.hbm [shape: f32[128,128], index: 4, kind: input, shape index: {}]   ;;  %s5389_s5 = inlined_call_operand.vmem [shape: f32[1,128], index: 5, kind: input, shape index: {}]   ;;  %s5390_s6 = inlined_call_operand.hbm [shape: f32[128,128], index: 6, kind: input, shape index: {}]   ;;  %s5391_s7 = inlined_call_operand.vmem [shape: f32[1,128], index: 7, kind: input, shape index: {}]   ;;  %s5392_s8 = inlined_call_operand.hbm [shape: f32[640,128], index: 8, kind: output, shape index: {}]  }
   0x1   :  { %5412 = sst [smem:[#allocation24_spill]] %s5384_s0 }
   0x2   :  { %5413 = sst [smem:[#allocation25_spill]] %s5385_s1 }
   0x3   :  { %5414 = sst [smem:[#allocation26_spill]] %s5388_s4 }
   0x4   :  { %5415 = sst [smem:[#allocation27_spill]] %s5392_s8 }
   0x5   :  { %13 = vsyncpa [#allocation3], 0 }
   0x6   :  { %15 = vsyncpa [#allocation3 + $0x1], 0 }
   0x7   :  { %16 = vsyncpa [#allocation6], 0 }
   0x8   :  { %17 = vsyncpa [#allocation10], 0 }
   0x9   :  { %18 = vsyncpa [#allocation4], 0 }
   0xa   :  { %20 = vsyncpa [#allocation4 + $0x1], 0  ;;  %s4634_s27 = smov 0   ;;  %s4636_s28 = smov 0  }
   0xb   :  { %s4638_s29 = smov 0   ;;  %s4640_s30 = smov 0  }
   0xc LB: > { %5416 = sst [smem:[#allocation19_spill]] %s4559_s27  ;;  %s4655_s9 = sadd.s32 4294967295, %s4571_s30   ;;  %s4571_s30 = sphi %s4640_s30, %s5452_s30   ;;  %s4567_s29 = sphi %s4638_s29, %s5454_s29   ;;  %s4563_s28 = sphi %s4636_s28, %s5456_s28   ;;  %s4559_s27 = sphi %s4634_s27, %s5455_s27  }
   0xd   : > { %5417 = sst [smem:[#allocation20_spill]] %s4567_s29  ;;  %s3125_s10 = sadd.s32 4294967294, %s4571_s30  }
   0xe   : > { %p46_p0 = scmp.ne.s32.totalorder %s4563_s28, %s4559_s27  ;;  %p5393_p1 = scmp.eq.s32.totalorder %s4655_s9, 0 }
   0xf   : > { %p228_p3 = scmp.eq.s32.totalorder %s3125_s10, 1  ;;  %p3126_p5 = scmp.ge.s32.totalorder %s4571_s30, 1 }
  0x10   : > { %p4664_p4 = por %p5393_p1, %p46_p0  ;;  %p235_p7 = scmp.lt.s32.totalorder %s4571_s30, 3 }
  0x11   : > { %p4669_p6 = por %p228_p3, %p46_p0  ;;  %s4573_s14 = smov [#allocation5]  }
  0x12   : > { %s5418_s11 = scalar_select %p4664_p4, 1, 0 }
  0x13   : > { %s5419_s12 = scalar_select %p4669_p6, 1, 0 }
  0x14   : > { %p4674_p8 = pnand %p3126_p5, %p235_p7  ;;  %s247_s15 = sshll.u32 %s4573_s14, 4  ;;  %s248_s15 = int_to_ptr.vmem [resolvable:$true] %s247_s15 }
  0x15   : > { %5420 = sst [smem:[#allocation21_spill]] %s5419_s12  ;;  %s4574_s17 = smov [#allocation9]  }
  0x16   : > { %s5421_s13 = scalar_select %p4674_p8, 1, 0 }
  0x17   : > { %p4057_p9 = pneg %p4674_p8  ;;  %s273_s18 = sshll.u32 %s4574_s17, 4  ;;  %s274_s18 = int_to_ptr.vmem [resolvable:$true] %s273_s18 }
  0x18   : > { %s5423_s1 = sld [smem:[#allocation25_spill]] }
  0x19   : > { %p4683_p11 = pnand %p4057_p9, %p5393_p1 }
  0x1b   : > { %s5422_s16 = scalar_select %p4683_p11, 1, 0 }
  0x1c   : > { %p4695_p13 = pneg %p4683_p11 }
  0x1e   : > { %s4317_s21 = scalar_lea.hbm %s5423_s1, 5120 }
  0x1f   : > { %p4318_p12 = scmp.ne.s32.totalorder %s5423_s1, %s4317_s21  ;;  %p4324_p5 = scmp.lt.u32.totalorder %s4317_s21, %s5423_s1 }
  0x21   : > { %p4320_p0 = pnand %p4695_p13, %p4318_p12 }
  0x23   : > { %p4321_p3 = pneg %p4320_p0 }
  0x25   : > { %p4326_p7 = pnand %p4324_p5, %p4321_p3 }
  0x27   : > { %4329 = shalt.err (!%p4326_p7)
}
  0x28   : > { %s4330_s10 = scalar_lea.vmem %s248_s15, 5120  ;;  %p4338_p2 = scmp.lt.s32.totalorder %s248_s15, %s248_s15 }
  0x29   : > { %p4331_p9 = scmp.ne.s32.totalorder %s248_s15, %s4330_s10  ;;  %p4339_p6 = scmp.lt.s32.totalorder %s4330_s10, %s4330_s10 }
  0x2b   : > { %p4333_p10 = pnand %p4331_p9, %p4695_p13  ;;  %p4340_p4 = por %p4339_p6, %p4338_p2 }
  0x2d   : > { %p4334_p1 = pneg %p4333_p10 }
  0x2f   : > { %p4341_p8 = pnand %p4340_p4, %p4334_p1 }
  0x31   : > { %4344 = shalt.err (!%p4341_p8)
}
  0x32   : > { %s4575_s14 = smov 64   ;;  %s4576_s17 = smov 4  }
  0x33   : > { %4060 = dma.hbm_to_vmem [thread:$0]  (!%p4683_p11), %s5423_s1, 5120, %s248_s15, [#allocation6], %s4575_s14, %s4575_s14, %s4576_s17  }
  0x34   : > { %s5425_s4 = sld [smem:[#allocation26_spill]] }
  0x3a   : > { %s4345_s23 = scalar_lea.hbm %s5425_s4, 2048 }
  0x3b   : > { %p4346_p2 = scmp.ne.s32.totalorder %s5425_s4, %s4345_s23  ;;  %p4352_p6 = scmp.lt.u32.totalorder %s4345_s23, %s5425_s4 }
  0x3d   : > { %p4348_p1 = pnand %p4346_p2, %p4695_p13 }
  0x3f   : > { %p4349_p4 = pneg %p4348_p1 }
  0x41   : > { %p4354_p8 = pnand %p4352_p6, %p4349_p4 }
  0x43   : > { %4357 = shalt.err (!%p4354_p8)
}
  0x44   : > { %s4358_s19 = scalar_lea.vmem %s274_s18, 2048  ;;  %p4366_p3 = scmp.lt.s32.totalorder %s274_s18, %s274_s18 }
  0x45   : > { %p4359_p10 = scmp.ne.s32.totalorder %s274_s18, %s4358_s19  ;;  %p4367_p5 = scmp.lt.s32.totalorder %s4358_s19, %s4358_s19 }
  0x47   : > { %p4361_p12 = pnand %p4359_p10, %p4695_p13  ;;  %p4368_p7 = por %p4367_p5, %p4366_p3 }
  0x49   : > { %p4362_p0 = pneg %p4361_p12 }
  0x4b   : > { %p4369_p9 = pnand %p4368_p7, %p4362_p0 }
  0x4d   : > { %4372 = shalt.err (!%p4369_p9)
}
  0x4e   : > { %s5397_s15 = smov 128   ;;  %s5399_s12 = smov 8  }
  0x4f   : > { %4066 = dma.hbm_to_vmem [thread:$0]  (!%p4683_p11), %s5425_s4, 2048, %s274_s18, [#allocation10], %s5397_s15, %s5397_s15, %s5399_s12  }
  0x50   : > { %s4733_s20 = sadd.s32 1, %s4571_s30   ;;  %s33_s22 = sadd.s32 1, %s4567_s29 }
  0x51   : > { %5426 = sst [smem:[#allocation22_spill]] %s4733_s20  ;;  %s30_s21 = ssub.s32 %s4571_s30, %s4733_s20 }
  0x52   : > { %p31_p2 = scmp.eq.s32.totalorder %s30_s21, 0  ;;  %p40_p1 = scmp.ne.s32.totalorder %s4567_s29, %s4563_s28 }
  0x53   : > { %p41_p4 = scmp.eq.s32.totalorder %s4571_s30, 0  ;;  %p4085_p6 = scmp.lt.s32.totalorder %s4571_s30, 2 }
  0x54   : > { %s4743_s23 = scalar_select %p31_p2, %s4567_s29, %s33_s22  }
  0x55   : > { %p42_p8 = por %p41_p4, %p40_p1  ;;  %p5428_p10 = scmp.eq.s32.totalorder %s4655_s9, 1 }
  0x56   : > { %5427 = sst [smem:[#allocation23_spill]] %s4743_s23  ;;  %s306_s26 = sand.u32 1, %s4571_s30  }
  0x57   : > { %p4747_p12 = por %p5428_p10, %p40_p1  ;;  %s308_s10 = sand.u32 1, %s4567_s29  }
  0x58   : > { %s4030_s18 = smul.u32 800, %s308_s10  ;;  %p4754_p0 = pnand %p4085_p6, %p42_p8 }
  0x59   : > { %s5429_s25 = scalar_select %p4747_p12, 1, 0 }
  0x5a   : > { %s4086_s19 = smul.u32 12800, %s4571_s30  ;;  %s5431_s0 = sld [smem:[#allocation24_spill]] }
  0x5b   : > { %s5430_s14 = scalar_select %p4754_p0, 1, 0 }
  0x5c   : > { %s310_s15 = scalar_lea.vmem [#allocation2], %s4030_s18  ;;  %s4765_s1 = smul.u32 320, %s308_s10 }
  0x5d   : > { %s318_s12 = sshll.u32 %s310_s15, 4  ;;  %s4767_s4 = scalar_lea.sflag [#allocation3], %s306_s26  ;;  %s4763_s12 = int_to_ptr.vmem [resolvable:$true] %s318_s12 }
  0x5e   : > { %p5409_p5 = pneg %p4754_p0 }
  0x60   : > { %s4761_s22 = scalar_lea.hbm %s5431_s0, %s4086_s19  ;;  %s4378_s21 = scalar_lea.hbm %s5431_s0, 25600 }
  0x61   : > { %s4373_s23 = scalar_lea.hbm %s4761_s22, 12800  ;;  %p4379_p2 = scmp.lt.u32.totalorder %s4761_s22, %s5431_s0 }
  0x62   : > { %p4374_p3 = scmp.ne.s32.totalorder %s4761_s22, %s4373_s23  ;;  %p4380_p1 = scmp.lt.u32.totalorder %s4378_s21, %s4373_s23 }
  0x63   : > { %p4382_p6 = scmp.lt.u32.totalorder %s4373_s23, %s4761_s22 }
  0x64   : > { %p4376_p7 = pnand %p5409_p5, %p4374_p3  ;;  %p4381_p4 = por %p4380_p1, %p4379_p2 }
  0x66   : > { %p4377_p9 = pneg %p4376_p7  ;;  %p4383_p8 = por %p4382_p6, %p4381_p4 }
  0x68   : > { %p4384_p10 = pnand %p4383_p8, %p4377_p9 }
  0x6a   : > { %4387 = shalt.err (!%p4384_p10)
}
  0x6b   : > { %s4388_s26 = scalar_lea.vmem %s4763_s12, 12800  ;;  %s4579_s10 = smov [#allocation2]  }
  0x6c   : > { %p4389_p3 = scmp.ne.s32.totalorder %s4763_s12, %s4388_s26  ;;  %s4393_s19 = sshll.u32 %s4579_s10, 4  ;;  %s4394_s19 = int_to_ptr.vmem [resolvable:$false] %s4393_s19 }
  0x6d   : > { %s4395_s17 = scalar_lea.vmem %s4394_s19, 25600  ;;  %p4396_p11 = scmp.lt.s32.totalorder %s4763_s12, %s4394_s19 }
  0x6e   : > { %p4391_p7 = pnand %p4389_p3, %p5409_p5  ;;  %p4397_p2 = scmp.lt.s32.totalorder %s4395_s17, %s4388_s26 }
  0x70   : > { %p4392_p12 = pneg %p4391_p7  ;;  %p4398_p1 = por %p4397_p2, %p4396_p11 }
  0x72   : > { %p4399_p4 = pnand %p4398_p1, %p4392_p12 }
  0x74   : > { %4402 = shalt.err (!%p4399_p4)
}
  0x75   : > { %s4580_s23 = smov 320   ;;  %s4581_s21 = smov 20  }
  0x76   : > { %4073 = dma.hbm_to_vmem [thread:$0]  (!%p4754_p0), %s4761_s22, 12800, %s4763_s12, %s4767_s4, %s4580_s23, %s4580_s23, %s4581_s21  }
  0x77   : > { %s4582_s18 = smov [#allocation8]   ;;  %s4583_s10 = smov [#allocation11]  }
  0x78   : > { %s260_s15 = sshll.u32 %s4582_s18, 4  ;;  %s289_s0 = sshll.u32 %s4583_s10, 4  ;;  %s261_s15 = int_to_ptr.vmem [resolvable:$true] %s260_s15  ;;  %s290_s0 = int_to_ptr.vmem [resolvable:$true] %s289_s0 }
  0x79   : > { %s4403_s26 = scalar_lea.hbm %s5387_s3, 2048 }
  0x7a   : > { %p4404_p11 = scmp.ne.s32.totalorder %s5387_s3, %s4403_s26  ;;  %p4410_p6 = scmp.lt.u32.totalorder %s4403_s26, %s5387_s3 }
  0x7c   : > { %p4406_p12 = pnand %p4404_p11, %p4695_p13 }
  0x7e   : > { %p4407_p9 = pneg %p4406_p12 }
  0x80   : > { %p4412_p8 = pnand %p4410_p6, %p4407_p9 }
  0x82   : > { %4415 = shalt.err (!%p4412_p8)
}
  0x83   : > { %s4416_s12 = scalar_lea.vmem %s261_s15, 2048  ;;  %p4424_p2 = scmp.lt.s32.totalorder %s261_s15, %s261_s15 }
  0x84   : > { %p4417_p10 = scmp.ne.s32.totalorder %s261_s15, %s4416_s12  ;;  %p4425_p1 = scmp.lt.s32.totalorder %s4416_s12, %s4416_s12 }
  0x86   : > { %p4419_p3 = pnand %p4417_p10, %p4695_p13  ;;  %p4426_p4 = por %p4425_p1, %p4424_p2 }
  0x88   : > { %p4420_p7 = pneg %p4419_p3 }
  0x8a   : > { %p4427_p5 = pnand %p4426_p4, %p4420_p7 }
  0x8c   : > { %4430 = shalt.err (!%p4427_p5)
}
  0x8d   : > { %p5432_p11 = scmp.ne.s32.totalorder %s5422_s16, 0  ;;  %s5433_s29 = smov 8  }
  0x8e   : > { %s5434_s20 = smov 128   ;;  %s3284_s22 = smul.u32 5120, %s4571_s30 }
  0x8f   : > { %4063 = dma.hbm_to_vmem [thread:$0]  (!%p5432_p11), %s5387_s3, 2048, %s261_s15, [#allocation6], %s5434_s20, %s5434_s20, %s5433_s29  }
  0x90   : > { %s4431_s18 = scalar_lea.hbm %s5390_s6, 2048 }
  0x91   : > { %p4432_p5 = scmp.ne.s32.totalorder %s5390_s6, %s4431_s18  ;;  %p4438_p6 = scmp.lt.u32.totalorder %s4431_s18, %s5390_s6 }
  0x93   : > { %p4434_p12 = pnand %p4432_p5, %p4695_p13 }
  0x95   : > { %p4435_p9 = pneg %p4434_p12 }
  0x97   : > { %p4440_p8 = pnand %p4438_p6, %p4435_p9 }
  0x99   : > { %4443 = shalt.err (!%p4440_p8)
}
  0x9a   : > { %s4444_s15 = scalar_lea.vmem %s290_s0, 2048  ;;  %p4452_p2 = scmp.lt.s32.totalorder %s290_s0, %s290_s0 }
  0x9b   : > { %p4445_p10 = scmp.ne.s32.totalorder %s290_s0, %s4444_s15  ;;  %p4453_p1 = scmp.lt.s32.totalorder %s4444_s15, %s4444_s15 }
  0x9d   : > { %p4447_p3 = pnand %p4445_p10, %p4695_p13  ;;  %p4454_p4 = por %p4453_p1, %p4452_p2 }
  0x9f   : > { %p4448_p7 = pneg %p4447_p3 }
  0xa1   : > { %p4455_p0 = pnand %p4454_p4, %p4448_p7 }
  0xa3   : > { %4458 = shalt.err (!%p4455_p0)
}
  0xa4   : > { %4069 = dma.hbm_to_vmem [thread:$0]  (!%p5432_p11), %s5390_s6, 2048, %s290_s0, [#allocation10], %s5434_s20, %s5434_s20, %s5433_s29  }
  0xa5   : > { %s4841_s23 = scalar_lea.hbm %s5386_s2, %s3284_s22  ;;  %s332_s21 = scalar_lea.vmem [#allocation7], %s4765_s1 }
  0xa6   : > { %s339_s16 = sshll.u32 %s332_s21, 4  ;;  %s4459_s18 = scalar_lea.hbm %s4841_s23, 5120  ;;  %s4844_s16 = int_to_ptr.vmem [resolvable:$true] %s339_s16 }
  0xa7   : > { %p4460_p13 = scmp.ne.s32.totalorder %s4841_s23, %s4459_s18  ;;  %p5435_p0 = scmp.ne.s32.totalorder %s5430_s14, 0 }
  0xa8   : > { %s4464_s19 = scalar_lea.hbm %s5386_s2, 10240  ;;  %p4465_p11 = scmp.lt.u32.totalorder %s4841_s23, %s5386_s2 }
  0xa9   : > { %p5436_p5 = pneg %p5435_p0  ;;  %p4466_p6 = scmp.lt.u32.totalorder %s4464_s19, %s4459_s18 }
  0xaa   : > { %p4468_p10 = scmp.lt.u32.totalorder %s4459_s18, %s4841_s23 }
  0xab   : > { %p4462_p12 = pnand %p4460_p13, %p5436_p5  ;;  %p4467_p8 = por %p4466_p6, %p4465_p11 }
  0xad   : > { %p4463_p9 = pneg %p4462_p12  ;;  %p4469_p3 = por %p4468_p10, %p4467_p8 }
  0xaf   : > { %p4470_p7 = pnand %p4469_p3, %p4463_p9 }
  0xb1   : > { %4473 = shalt.err (!%p4470_p7)
}
  0xb2   : > { %s4474_s1 = scalar_lea.vmem %s4844_s16, 5120  ;;  %p5437_p1 = pmov %p5436_p5 }
  0xb3   : > { %p4475_p2 = scmp.ne.s32.totalorder %s4844_s16, %s4474_s1  ;;  %s4584_s17 = smov [#allocation7]  }
  0xb4   : > { %s4479_s15 = sshll.u32 %s4584_s17, 4  ;;  %s4480_s15 = int_to_ptr.vmem [resolvable:$false] %s4479_s15 }
  0xb5   : > { %p4477_p4 = pnand %p4475_p2, %p5437_p1  ;;  %s4481_s12 = scalar_lea.vmem %s4480_s15, 10240 }
  0xb6   : > { %p4482_p5 = scmp.lt.s32.totalorder %s4844_s16, %s4480_s15  ;;  %p4483_p12 = scmp.lt.s32.totalorder %s4481_s12, %s4474_s1 }
  0xb7   : > { %p4478_p13 = pneg %p4477_p4 }
  0xb8   : > { %p4484_p11 = por %p4483_p12, %p4482_p5 }
  0xba   : > { %p4485_p6 = pnand %p4484_p11, %p4478_p13 }
  0xbc   : > { %4488 = shalt.err (!%p4485_p6)
}
  0xbd   : > { %4076 = dma.hbm_to_vmem [thread:$0]  (!%p5435_p0), %s4841_s23, 5120, %s4844_s16, %s4767_s4, %s5434_s20, %s5434_s20, %s5433_s29  }
  0xbe   : > { %p5438_p9 = scmp.ne.s32.totalorder %s5421_s13, 0 }
  0xbf   : > { %s353_s8 = sand.u32 (!%p5438_p9), 1, %s4655_s9   ;;  %s4877_s27 = sand.u32 (!%p5438_p9), 1, %s4563_s28  }
  0xc0   : > { %351 = sbr.rel (%p5438_p9) target bundleno = 1254 (0x4e6), region = 52  ;;  %s354_s21 = scalar_lea.sflag (!%p5438_p9), [#allocation3], %s353_s8 }
  0xc1   : > { %s4033_s24 = smul.u32 (!%p5438_p9), 800, %s4877_s27  ;;  %p5439_p8 = scmp.ne.s32.totalorder (!%p5438_p9), %s5418_s11, 0 }
  0xc3   : > { %s4880_s14 = scalar_lea.vmem (!%p5438_p9), [#allocation2], %s4033_s24 }
  0xc7   : > { %4534 = dma.done.wait (%p5439_p8), %s354_s21, 12800  }
  0xc8   : > { %4536 = vsyncadd (%p5439_p8), %s354_s21, 4294954496  ;;  %p5440_p0 = scmp.eq.s32.totalorder %s4655_s9, 0 }
  0xca   : > { %4538 = dma.done.wait (%p5440_p0), [#allocation6], 5120   ;;  %p5441_p10 = pmov %p5440_p0 }
  0xcb   : > { %s4034_s4 = smul.u32 320, %s4877_s27 }
  0xcc   : > { %4540 = vsyncadd (%p5441_p10), [#allocation6], 4294962176 }
  0xcd   : > { %s4893_s13 = scalar_lea.vmem [#allocation7], %s4034_s4 }
  0xce   : > { %4542 = dma.done.wait (%p5439_p8), %s354_s21, 5120  }
  0xcf   : > { %4544 = vsyncadd (%p5439_p8), %s354_s21, 4294962176  ;;  %p5442_p3 = pmov %p5440_p0 }
  0xd0   : > { %p5443_p7 = pmov %p5440_p0 }
  0xd1   : > { %4546 = dma.done.wait (%p5442_p3), [#allocation6], 2048  }
  0xd2   : > { %4548 = vsyncadd (%p5443_p7), [#allocation6], 4294965248  ;;  %p5444_p2 = pmov %p5440_p0 }
  0xd3   : > { %p5445_p1 = pmov %p5440_p0 }
  0xd4   : > { %4550 = dma.done.wait (%p5444_p2), [#allocation10], 4096  }
  0xd5   : > { %4552 = vsyncadd (%p5445_p1), [#allocation10], 4294963200  ;;  %v4585_v0 = vmov 0   ;;  %v4137_v1 = vld [vmem:[#allocation5] sm:$0xff]   ;;  %v4138_v2 = vld [vmem:[#allocation5 + $0x8] sm:$0xff]   ;;  %s5253_s16 = scalar_lea.vmem [#allocation12], %s4034_s4 }
  0xd6   : > { %1384 = vmatprep.subr.bf16.mxu0 %v4585_v0  ;;  %v4139_v3 = vld [vmem:[#allocation5 + $0x10] sm:$0xff]   ;;  %v4140_v4 = vld [vmem:[#allocation5 + $0x18] sm:$0xff]   ;;  %v4141_v5 = vld [vmem:[#allocation5 + $0x20] sm:$0xff]   ;;  %s3285_s18 = smul.u32 5120, %s4655_s9  ;;  %s2994_s0 = sshll.u32 %s5253_s16, 4  ;;  %s5337_s0 = int_to_ptr.vmem [resolvable:$true] %s2994_s0 }
  0xd7   : > { %1385 = vmatpush1.bf16.msra.mxu0 %v4137_v1  ;;  %v4155_v6 = vld [vmem:[%s4880_s14 + $0x4] ss:$20 sps:$4 sm:$0xff]   ;;  %v4142_v7 = vld [vmem:[#allocation5 + $0x28] sm:$0xff]   ;;  %v4143_v8 = vld [vmem:[#allocation5 + $0x30] sm:$0xff]   ;;  %s5446_s22 = sld [smem:[#allocation27_spill]]  ;;  %s2981_s9 = scalar_lea.sflag [#allocation4], %s4877_s27 }
  0xd8   : > { %1386 = vmatprep.subr.bf16.mxu0 %v4585_v0  ;;  %1416 = vmatprep.mubr.bf16.mxu0 %v4155_v6  ;;  %v4144_v9 = vld [vmem:[#allocation5 + $0x38] sm:$0xff]   ;;  %v4145_v10 = vld [vmem:[#allocation5 + $0x40] sm:$0xff]   ;;  %v4146_v11 = vld [vmem:[#allocation5 + $0x48] sm:$0xff]   ;;  %s4489_s1 = scalar_lea.vmem %s5337_s0, 5120  ;;  %p5447_p13 = scmp.ne.s32.totalorder %s5429_s25, 0 }
  0xd9   : > { %v4147_v12 = vld [vmem:[#allocation5 + $0x50] sm:$0xff]   ;;  %v4148_v13 = vld [vmem:[#allocation5 + $0x58] sm:$0xff]   ;;  %v4149_v14 = vld [vmem:[#allocation5 + $0x60] sm:$0xff]   ;;  %p4490_p4 = scmp.ne.s32.totalorder %s5337_s0, %s4489_s1  ;;  %s4586_s17 = smov [#allocation12]  }
  0xda   : > { %v4150_v15 = vld [vmem:[#allocation5 + $0x68] sm:$0xff]   ;;  %v4151_v16 = vld [vmem:[#allocation5 + $0x70] sm:$0xff]   ;;  %v4152_v17 = vld [vmem:[#allocation5 + $0x78] sm:$0xff]   ;;  %s4493_s15 = sshll.u32 %s4586_s17, 4  ;;  %s4494_s15 = int_to_ptr.vmem [resolvable:$false] %s4493_s15 }
  0xdb   : > { %1387 = vmatpush1.bf16.msra.mxu0 %v4138_v2  ;;  %v4216_v18 = vld [vmem:[#allocation5 + $0x100] sm:$0xff]   ;;  %v4219_v22 = vld [vmem:[#allocation5 + $0x108] sm:$0xff]   ;;  %v4222_v24 = vld [vmem:[#allocation5 + $0x110] sm:$0xff]   ;;  %p4491_p5 = pnand %p4490_p4, %p5447_p13  ;;  %s4495_s12 = scalar_lea.vmem %s4494_s15, 10240 }
  0xdc   : > { %1388 = vmatprep.subr.bf16.mxu0 %v4585_v0  ;;  %v4153_v19 = vld [vmem:[%s4880_s14] ss:$20 sps:$4 sm:$0xff]   ;;  %3482 = vmatprep.subr.bf16.mxu1 %v4216_v18  ;;  %v4160_v23 = vld [vmem:[#allocation5 + $0x88] sm:$0xff]   ;;  %v4224_v28 = vld [vmem:[#allocation5 + $0x118] sm:$0xff]   ;;  %p4496_p11 = scmp.lt.s32.totalorder %s5337_s0, %s4494_s15  ;;  %p4497_p6 = scmp.lt.s32.totalorder %s4495_s12, %s4489_s1 }
  0xdd   : > { %v4156_v20 = vld [vmem:[#allocation5 + $0x80] sm:$0xff]   ;;  %3483 = vmatpush3.bf16.msra.mxu1 %v4216_v18  ;;  %v4159_v25 = vld [vmem:[%s4880_s14 + $0x28] ss:$20 sps:$4 sm:$0xff]   ;;  %v4164_v27 = vld [vmem:[#allocation5 + $0x90] sm:$0xff]   ;;  %s5335_s26 = scalar_lea.hbm %s5446_s22, %s3285_s18  ;;  %p4492_p12 = pneg %p4491_p5 }
  0xde   : > { %v4157_v21 = vld [vmem:[%s4880_s14 + $0x2c] ss:$20 sps:$4 sm:$0xff]   ;;  %3484 = vmatprep.subr.bf16.mxu1 %v4219_v22  ;;  %v4161_v26 = vld [vmem:[%s4880_s14 + $0x54] ss:$20 sps:$4 sm:$0xff]   ;;  %v4170_v29 = vld [vmem:[#allocation5 + $0x98] sm:$0xff]   ;;  %p4498_p9 = por %p4497_p6, %p4496_p11 }
  0xdf   : > { %1389 = vmatpush1.bf16.msra.mxu0 %v4139_v3  ;;  %v4228_v30 = vld [vmem:[#allocation5 + $0x120] sm:$0xff]   ;;  %v4165_v32 = vld [vmem:[%s4880_s14 + $0x7c] ss:$20 sps:$4 sm:$0xff]   ;;  %v4230_v34 = vld [vmem:[#allocation5 + $0x128] sm:$0xff]  }
  0xe0   : > { %1390 = vmatprep.subr.bf16.mxu0 %v4585_v0  ;;  %v4163_v31 = vld [vmem:[%s4880_s14 + $0x50] ss:$20 sps:$4 sm:$0xff]   ;;  %v4179_v35 = vld [vmem:[#allocation5 + $0xa8] sm:$0xff]   ;;  %v4236_v40 = vld [vmem:[#allocation5 + $0x138] sm:$0xff]   ;;  %p4499_p8 = pnand %p4498_p9, %p4492_p12 }
  0xe1   : > { %3485 = vmatpush3.bf16.msra.mxu1 %v4219_v22  ;;  %v4175_v33 = vld [vmem:[#allocation5 + $0xa0] sm:$0xff]   ;;  %v4234_v36 = vld [vmem:[#allocation5 + $0x130] sm:$0xff]   ;;  %v4167_v37 = vld [vmem:[%s4880_s14 + $0x78] ss:$20 sps:$4 sm:$0xff]  }
  0xe2   : > { %3486 = vmatprep.subr.bf16.mxu1 %v4222_v24  ;;  %v4168_v38 = vld [vmem:[%s4880_s14 + $0xa4] ss:$20 sps:$4 sm:$0xff]   ;;  %v4183_v39 = vld [vmem:[#allocation5 + $0xb0] sm:$0xff]   ;;  %v4172_v45 = vld [vmem:[%s4880_s14 + $0xcc] ss:$20 sps:$4 sm:$0xff]  }
  0xe3   : > { %1391 = vmatpush1.bf16.msra.mxu0 %v4140_v4  ;;  %v4237_v41 = vld [vmem:[%s4880_s14 + $0x10] ss:$20 sps:$4 sm:$0xff]   ;;  %v4189_v42 = vld [vmem:[#allocation5 + $0xb8] sm:$0xff]   ;;  %v4171_v44 = vld [vmem:[%s4880_s14 + $0xa0] ss:$20 sps:$4 sm:$0xff]  }
  0xe4   : > { %1392 = vmatprep.subr.bf16.mxu0 %v4585_v0  ;;  %v4241_v43 = vld [vmem:[%s4880_s14 + $0x38] ss:$20 sps:$4 sm:$0xff]   ;;  %3498 = vmatprep.mubr.bf16.mxu1 %v4237_v41  ;;  %v4194_v46 = vld [vmem:[#allocation5 + $0xc0] sm:$0xff]   ;;  %v4174_v48 = vld [vmem:[%s4880_s14 + $0xc8] ss:$20 sps:$4 sm:$0xff]  }
  0xe5   : > { %3487 = vmatpush3.bf16.msra.mxu1 %v4222_v24  ;;  %v4198_v47 = vld [vmem:[#allocation5 + $0xc8] sm:$0xff]   ;;  %v4202_v50 = vld [vmem:[#allocation5 + $0xd0] sm:$0xff]   ;;  %v4208_v52 = vld [vmem:[#allocation5 + $0xd8] sm:$0xff]  }
  0xe6   : > { %3488 = vmatprep.subr.bf16.mxu1 %v4224_v28  ;;  %v4176_v49 = vld [vmem:[%s4880_s14 + $0xf4] ss:$20 sps:$4 sm:$0xff]   ;;  %v4178_v54 = vld [vmem:[%s4880_s14 + $0xf0] ss:$20 sps:$4 sm:$0xff]   ;;  %v4182_v58 = vld [vmem:[%s4880_s14 + $0x118] ss:$20 sps:$4 sm:$0xff]  }
  0xe7   : > { %1393 = vmatpush1.bf16.msra.mxu0 %v4141_v5  ;;  %v4245_v51 = vld [vmem:[%s4880_s14 + $0x60] ss:$20 sps:$4 sm:$0xff]   ;;  %v4248_v53 = vld [vmem:[%s4880_s14 + $0x88] ss:$20 sps:$4 sm:$0xff]   ;;  %v4184_v59 = vld [vmem:[%s4880_s14 + $0x144] ss:$20 sps:$4 sm:$0xff]  }
  0xe8   : > { %1394 = vmatprep.subr.bf16.mxu0 %v4585_v0  ;;  %v4180_v55 = vld [vmem:[%s4880_s14 + $0x11c] ss:$20 sps:$4 sm:$0xff]   ;;  %v4213_v56 = vld [vmem:[#allocation5 + $0xe0] sm:$0xff]   ;;  %v4218_v57 = vld [vmem:[#allocation5 + $0xe8] sm:$0xff]  }
  0xe9   : > { %3489 = vmatpush3.bf16.msra.mxu1 %v4224_v28  ;;  %v4225_v60 = vld [vmem:[#allocation5 + $0xf0] sm:$0xff]   ;;  %v4233_v62 = vld [vmem:[#allocation5 + $0xf8] sm:$0xff]   ;;  %v4187_v2 = vld [vmem:[%s4880_s14 + $0x16c] ss:$20 sps:$4 sm:$0xff]  }
  0xea   : > { %3490 = vmatprep.subr.bf16.mxu1 %v4228_v30  ;;  %v4253_v61 = vld [vmem:[%s4880_s14 + $0xb0] ss:$20 sps:$4 sm:$0xff]   ;;  %v4256_v63 = vld [vmem:[%s4880_s14 + $0xd8] ss:$20 sps:$4 sm:$0xff]   ;;  %v4186_v1 = vld [vmem:[%s4880_s14 + $0x140] ss:$20 sps:$4 sm:$0xff]  }
  0xeb   : > { %1395 = vmatpush1.bf16.msra.mxu0 %v4142_v7  ;;  %v4190_v3 = vld [vmem:[%s4880_s14 + $0x168] ss:$20 sps:$4 sm:$0xff]   ;;  %v4261_v5 = vld [vmem:[%s4880_s14 + $0x100] ss:$20 sps:$4 sm:$0xff]   ;;  %v4193_v6 = vld [vmem:[%s4880_s14 + $0x190] ss:$20 sps:$4 sm:$0xff]  }
  0xec   : > { %1396 = vmatprep.subr.bf16.mxu0 %v4585_v0  ;;  %v4191_v4 = vld [vmem:[%s4880_s14 + $0x194] ss:$20 sps:$4 sm:$0xff]   ;;  %v4195_v7 = vld [vmem:[%s4880_s14 + $0x1bc] ss:$20 sps:$4 sm:$0xff]   ;;  %v2019_v28 = vld [vmem:[#allocation9] sm:$0xff] }
  0xed   : > { %3491 = vmatpush3.bf16.msra.mxu1 %v4228_v30  ;;  %v4209_v18 = vld [vmem:[%s4880_s14 + $0x230] ss:$20 sps:$4 sm:$0xff]   ;;  %v4217_v24 = vld [vmem:[%s4880_s14 + $0x280] ss:$20 sps:$4 sm:$0xff]  }
  0xee   : > { %3492 = vmatprep.subr.bf16.mxu1 %v4230_v34  ;;  %v4285_v22 = vld [vmem:[%s4880_s14 + $0x1f0] ss:$20 sps:$4 sm:$0xff]  }
  0xef   : > { %1397 = vmatpush1.bf16.msra.mxu0 %v4143_v8  ;;  %v4197_v8 = vld [vmem:[%s4880_s14 + $0x1b8] ss:$20 sps:$4 sm:$0xff]   ;;  %v2025_v41 = vld [vmem:[#allocation9 + $0x30] sm:$0xff] }
  0xf0   : > { %1398 = vmatprep.subr.bf16.mxu0 %v4585_v0 }
  0xf1   : > { %3493 = vmatpush3.bf16.msra.mxu1 %v4230_v34 }
  0xf2   : > { %3494 = vmatprep.subr.bf16.mxu1 %v4234_v36 }
  0xf3   : > { %1399 = vmatpush1.bf16.msra.mxu0 %v4144_v9  ;;  %v4199_v9 = vld [vmem:[%s4880_s14 + $0x1e4] ss:$20 sps:$4 sm:$0xff]  }
  0xf4   : > { %1400 = vmatprep.subr.bf16.mxu0 %v4585_v0 }
  0xf5   : > { %3495 = vmatpush3.bf16.msra.mxu1 %v4234_v36  ;;  %v4229_v36 = vld [vmem:[%s4880_s14 + $0x2d0] ss:$20 sps:$4 sm:$0xff]  }
  0xf6   : > { %3496 = vmatprep.subr.bf16.mxu1 %v4236_v40 }
  0xf7   : > { %1401 = vmatpush1.bf16.msra.mxu0 %v4145_v10  ;;  %v4269_v10 = vld [vmem:[%s4880_s14 + $0x150] ss:$20 sps:$4 sm:$0xff]  }
  0xf8   : > { %1402 = vmatprep.subr.bf16.mxu0 %v4585_v0 }
  0xf9   : > { %3497 = vmatpush3.bf16.msra.mxu1 %v4236_v40 }
  0xfb   : > { %1403 = vmatpush1.bf16.msra.mxu0 %v4146_v11  ;;  %v4272_v11 = vld [vmem:[%s4880_s14 + $0x178] ss:$20 sps:$4 sm:$0xff]  }
  0xfc   : > { %1404 = vmatprep.subr.bf16.mxu0 %v4585_v0  ;;  %3499 = vmatmul.mubr.bf16.vlgmr.msra.gmra.mrb[0].mxu1 %v4241_v43 }
  0xfd   : > { %3502 = vmatprep.mubr.bf16.mxu1 %v4245_v51  ;;  %v2029_v51 = vld [vmem:[#allocation9 + $0x50] sm:$0xff] }
  0xff   : > { %1405 = vmatpush1.bf16.msra.mxu0 %v4147_v12  ;;  %v4201_v12 = vld [vmem:[%s4880_s14 + $0x1e0] ss:$20 sps:$4 sm:$0xff]  }
 0x100   : > { %1406 = vmatprep.subr.bf16.mxu0 %v4585_v0 }
 0x103   : > { %1407 = vmatpush1.bf16.msra.mxu0 %v4148_v13  ;;  %v4203_v13 = vld [vmem:[%s4880_s14 + $0x20c] ss:$20 sps:$4 sm:$0xff]  }
 0x104   : > { %1408 = vmatprep.subr.bf16.mxu0 %v4585_v0  ;;  %3503 = vmatmul.mubr.bf16.gmra.mrb[4].mxu1 %v4248_v53 }
 0x105   : > { %3506 = vmatprep.mubr.bf16.mxu1 %v4253_v61  ;;  %v2033_v61 = vld [vmem:[#allocation9 + $0x70] sm:$0xff] }
 0x107   : > { %1409 = vmatpush1.bf16.msra.mxu0 %v4149_v14  ;;  %v4205_v14 = vld [vmem:[%s4880_s14 + $0x208] ss:$20 sps:$4 sm:$0xff]  }
 0x108   : > { %1410 = vmatprep.subr.bf16.mxu0 %v4585_v0 }
 0x10b   : > { %1411 = vmatpush1.bf16.msra.mxu0 %v4150_v15  ;;  %v4206_v15 = vld [vmem:[%s4880_s14 + $0x234] ss:$20 sps:$4 sm:$0xff]  }
 0x10c   : > { %1412 = vmatprep.subr.bf16.mxu0 %v4585_v0  ;;  %3507 = vmatmul.mubr.bf16.gmra.mrb[8].mxu1 %v4256_v63 }
 0x10d   : > { %3510 = vmatprep.mubr.bf16.mxu1 %v4261_v5  ;;  %v1981_v5 = vld [vmem:[%s4893_s13 + $0x10] sm:$0xff] }
 0x10f   : > { %1413 = vmatpush1.bf16.msra.mxu0 %v4151_v16  ;;  %v4277_v16 = vld [vmem:[%s4880_s14 + $0x1a0] ss:$20 sps:$4 sm:$0xff]  }
 0x110   : > { %1414 = vmatprep.subr.bf16.mxu0 %v4585_v0 }
 0x113   : > { %1415 = vmatpush1.bf16.msra.mxu0 %v4152_v17  ;;  %v4280_v17 = vld [vmem:[%s4880_s14 + $0x1c8] ss:$20 sps:$4 sm:$0xff]  }
 0x114   : > { %1577 = vmatprep.subr.bf16.mxu0 %v4585_v0 }
 0x116   : > { %1417 = vmatmul.mubr.bf16.vlgmr.msra.gmra.mrb[0].mxu0 %v4153_v19  ;;  %v4210_v19 = vld [vmem:[%s4880_s14 + $0x25c] ss:$20 sps:$4 sm:$0xff]  }
 0x117   : > { %1578 = vmatpush1.bf16.msra.mxu0 %v4156_v20  ;;  %1424 = vmatprep.mubr.bf16.mxu0 %v4157_v21  ;;  %v4212_v20 = vld [vmem:[%s4880_s14 + $0x258] ss:$20 sps:$4 sm:$0xff]  }
 0x118   : > { %1579 = vmatprep.subr.bf16.mxu0 %v4585_v0  ;;  %v4214_v21 = vld [vmem:[%s4880_s14 + $0x284] ss:$20 sps:$4 sm:$0xff]  }
 0x11b   : > { %1580 = vmatpush1.bf16.msra.mxu0 %v4160_v23  ;;  %v4288_v23 = vld [vmem:[%s4880_s14 + $0x218] ss:$20 sps:$4 sm:$0xff]  }
 0x11c   : > { %1581 = vmatprep.subr.bf16.mxu0 %v4585_v0 }
 0x11e   : > { %1425 = vmatmul.mubr.bf16.gmra.mrb[4].mxu0 %v4159_v25  ;;  %v4220_v25 = vld [vmem:[%s4880_s14 + $0x2ac] ss:$20 sps:$4 sm:$0xff]  }
 0x11f   : > { %1432 = vmatprep.mubr.bf16.mxu0 %v4161_v26  ;;  %1582 = vmatpush1.bf16.msra.mxu0 %v4164_v27  ;;  %v4223_v26 = vld [vmem:[%s4880_s14 + $0x2a8] ss:$20 sps:$4 sm:$0xff]  }
 0x120   : > { %1583 = vmatprep.subr.bf16.mxu0 %v4585_v0  ;;  %v4226_v27 = vld [vmem:[%s4880_s14 + $0x2d4] ss:$20 sps:$4 sm:$0xff]  }
 0x123   : > { %1584 = vmatpush1.bf16.msra.mxu0 %v4170_v29  ;;  %v2020_v29 = vld [vmem:[#allocation9 + $0x8] sm:$0xff] }
 0x124   : > { %1585 = vmatprep.subr.bf16.mxu0 %v4585_v0  ;;  %v3814_v30 = vpack.c.bf16 %v2020_v29, %v2019_v28  ;;  %v1967_v29 = vld [vmem:[#allocation8 + $0x20] sm:$0xff] }
 0x126   : > { %1433 = vmatmul.mubr.bf16.gmra.mrb[8].mxu0 %v4163_v31  ;;  %3815 = vmatprep.subr.bf16.mxu1 %v3814_v30  ;;  %v2021_v31 = vld [vmem:[#allocation9 + $0x10] sm:$0xff] }
 0x127   : > { %1440 = vmatprep.mubr.bf16.mxu0 %v4165_v32  ;;  %1586 = vmatpush1.bf16.msra.mxu0 %v4175_v33  ;;  %v2022_v32 = vld [vmem:[#allocation9 + $0x18] sm:$0xff]  ;;  %v4293_v33 = vld [vmem:[%s4880_s14 + $0x240] ss:$20 sps:$4 sm:$0xff]  }
 0x128   : > { %1587 = vmatprep.subr.bf16.mxu0 %v4585_v0  ;;  %3817 = vmatpush3.bf16.msra.mxu1 %v3814_v30  ;;  %v3818_v34 = vpack.c.bf16 %v2022_v32, %v2021_v31  ;;  %v1968_v30 = vld [vmem:[#allocation8 + $0x28] sm:$0xff]  ;;  %v1994_v31 = vld [vmem:[%s4893_s13 + $0x78] sm:$0xff]  ;;  %v1995_v32 = vld [vmem:[%s4893_s13 + $0x80] sm:$0xff] }
 0x12a   : > { %3819 = vmatprep.subr.bf16.mxu1 %v3818_v34 }
 0x12b   : > { %1588 = vmatpush1.bf16.msra.mxu0 %v4179_v35  ;;  %v4296_v35 = vld [vmem:[%s4880_s14 + $0x268] ss:$20 sps:$4 sm:$0xff]  }
 0x12c   : > { %1589 = vmatprep.subr.bf16.mxu0 %v4585_v0  ;;  %3821 = vmatpush3.bf16.msra.mxu1 %v3818_v34  ;;  %v4260_v34 = vld [vmem:[%s4880_s14 + $0xd0] ss:$20 sps:$4 sm:$0xff]  }
 0x12e   : > { %1441 = vmatmul.mubr.bf16.gmra.mrb[12].mxu0 %v4167_v37  ;;  %v4231_v37 = vld [vmem:[%s4880_s14 + $0x2fc] ss:$20 sps:$4 sm:$0xff]  }
 0x12f   : > { %1448 = vmatprep.mubr.bf16.mxu0 %v4168_v38  ;;  %1590 = vmatpush1.bf16.msra.mxu0 %v4183_v39  ;;  %v2023_v38 = vld [vmem:[#allocation9 + $0x20] sm:$0xff]  ;;  %v2024_v39 = vld [vmem:[#allocation9 + $0x28] sm:$0xff] }
 0x130   : > { %1591 = vmatprep.subr.bf16.mxu0 %v4585_v0  ;;  %v3822_v40 = vpack.c.bf16 %v2024_v39, %v2023_v38  ;;  %v1996_v38 = vld [vmem:[%s4893_s13 + $0x88] sm:$0xff]  ;;  %v1997_v39 = vld [vmem:[%s4893_s13 + $0x90] sm:$0xff] }
 0x132   : > { %3823 = vmatprep.subr.bf16.mxu1 %v3822_v40 }
 0x133   : > { %1592 = vmatpush1.bf16.msra.mxu0 %v4189_v42  ;;  %v2026_v42 = vld [vmem:[#allocation9 + $0x38] sm:$0xff]  ;;  %3825 = vmatpush3.bf16.msra.mxu1 %v3822_v40 }
 0x134   : > { %1593 = vmatprep.subr.bf16.mxu0 %v4585_v0  ;;  %v3826_v43 = vpack.c.bf16 %v2026_v42, %v2025_v41  ;;  %v1971_v41 = vld [vmem:[#allocation8 + $0x40] sm:$0xff]  ;;  %v1972_v42 = vld [vmem:[#allocation8 + $0x48] sm:$0xff] }
 0x136   : > { %1449 = vmatmul.mubr.bf16.gmra.mrb[16].mxu0 %v4171_v44  ;;  %v4300_v44 = vld [vmem:[%s4880_s14 + $0x290] ss:$20 sps:$4 sm:$0xff]   ;;  %3827 = vmatprep.subr.bf16.mxu1 %v3826_v43 }
 0x137   : > { %1456 = vmatprep.mubr.bf16.mxu0 %v4172_v45  ;;  %1594 = vmatpush1.bf16.msra.mxu0 %v4194_v46  ;;  %v4235_v45 = vld [vmem:[%s4880_s14 + $0x2f8] ss:$20 sps:$4 sm:$0xff]  }
 0x138   : > { %1595 = vmatprep.subr.bf16.mxu0 %v4585_v0  ;;  %v4240_v46 = vld [vmem:[%s4880_s14 + $0xc] ss:$20 sps:$4 sm:$0xff]   ;;  %3829 = vmatpush3.bf16.msra.mxu1 %v3826_v43  ;;  %v1998_v43 = vld [vmem:[%s4893_s13 + $0x98] sm:$0xff] }
 0x13b   : > { %1596 = vmatpush1.bf16.msra.mxu0 %v4198_v47  ;;  %v2027_v47 = vld [vmem:[#allocation9 + $0x40] sm:$0xff] }
 0x13c   : > { %1597 = vmatprep.subr.bf16.mxu0 %v4585_v0 }
 0x13e   : > { %1457 = vmatmul.mubr.bf16.gmra.mrb[20].mxu0 %v4174_v48  ;;  %v2028_v48 = vld [vmem:[#allocation9 + $0x48] sm:$0xff] }
 0x13f   : > { %1464 = vmatprep.mubr.bf16.mxu0 %v4176_v49  ;;  %1598 = vmatpush1.bf16.msra.mxu0 %v4202_v50  ;;  %v4302_v49 = vld [vmem:[%s4880_s14 + $0x2b8] ss:$20 sps:$4 sm:$0xff]   ;;  %v3830_v50 = vpack.c.bf16 %v2028_v48, %v2027_v47  ;;  %v1973_v47 = vld [vmem:[#allocation8 + $0x50] sm:$0xff] }
 0x140   : > { %1599 = vmatprep.subr.bf16.mxu0 %v4585_v0  ;;  %v1974_v48 = vld [vmem:[#allocation8 + $0x58] sm:$0xff] }
 0x141   : > { %3831 = vmatprep.subr.bf16.mxu1 %v3830_v50 }
 0x142   : > { %3833 = vmatpush3.bf16.msra.mxu1 %v3830_v50  ;;  %v2000_v50 = vld [vmem:[%s4893_s13 + $0xa8] sm:$0xff] }
 0x143   : > { %1600 = vmatpush1.bf16.msra.mxu0 %v4208_v52  ;;  %v2030_v52 = vld [vmem:[#allocation9 + $0x58] sm:$0xff] }
 0x144   : > { %1601 = vmatprep.subr.bf16.mxu0 %v4585_v0  ;;  %v3834_v53 = vpack.c.bf16 %v2030_v52, %v2029_v51  ;;  %v2001_v51 = vld [vmem:[%s4893_s13 + $0xb0] sm:$0xff]  ;;  %v3866_v52 = vpack.c.bf16 %v1974_v48, %v1973_v47 }
 0x145   : > { %v4311_v48 = vld [vmem:[%s4880_s14 + $0x2dc] ss:$20 sps:$4 sm:$0xff]  }
 0x146   : > { %1465 = vmatmul.mubr.bf16.gmra.mrb[24].mxu0 %v4178_v54  ;;  %v4305_v54 = vld [vmem:[%s4880_s14 + $0x2e0] ss:$20 sps:$4 sm:$0xff]   ;;  %3835 = vmatprep.subr.bf16.mxu1 %v3834_v53 }
 0x147   : > { %1472 = vmatprep.mubr.bf16.mxu0 %v4180_v55  ;;  %1602 = vmatpush1.bf16.msra.mxu0 %v4213_v56  ;;  %v4238_v55 = vld [vmem:[%s4880_s14 + $0x8] ss:$20 sps:$4 sm:$0xff]  }
 0x148   : > { %1603 = vmatprep.subr.bf16.mxu0 %v4585_v0  ;;  %v4242_v56 = vld [vmem:[%s4880_s14 + $0x34] ss:$20 sps:$4 sm:$0xff]   ;;  %3837 = vmatpush3.bf16.msra.mxu1 %v3834_v53  ;;  %v1975_v53 = vld [vmem:[#allocation8 + $0x60] sm:$0xff] }
 0x14b   : > { %1604 = vmatpush1.bf16.msra.mxu0 %v4218_v57  ;;  %v2031_v57 = vld [vmem:[#allocation9 + $0x60] sm:$0xff] }
 0x14c   : > { %1605 = vmatprep.subr.bf16.mxu0 %v4585_v0 }
 0x14e   : > { %1473 = vmatmul.mubr.bf16.gmra.mrb[28].mxu0 %v4182_v58  ;;  %v2032_v58 = vld [vmem:[#allocation9 + $0x68] sm:$0xff] }
 0x14f   : > { %1480 = vmatprep.mubr.bf16.mxu0 %v4184_v59  ;;  %1606 = vmatpush1.bf16.msra.mxu0 %v4225_v60  ;;  %v4307_v59 = vld [vmem:[%s4880_s14 + $0x308] ss:$20 sps:$4 sm:$0xff]   ;;  %v3838_v60 = vpack.c.bf16 %v2032_v58, %v2031_v57  ;;  %v4268_v58 = vld [vmem:[%s4880_s14 + $0x120] ss:$20 sps:$4 sm:$0xff]  }
 0x150   : > { %1607 = vmatprep.subr.bf16.mxu0 %v4585_v0  ;;  %v4264_v0 = vld [vmem:[%s4880_s14 + $0x128] ss:$20 sps:$4 sm:$0xff]  }
 0x151   : > { %3511 = vmatmul.mubr.bf16.gmra.mrb[12].mxu1 %v4264_v0  ;;  %3839 = vmatprep.subr.bf16.mxu1 %v3838_v60  ;;  %v1982_v0 = vld [vmem:[%s4893_s13 + $0x18] sm:$0xff] }
 0x152   : > { %3514 = vmatprep.mubr.bf16.mxu1 %v4269_v10  ;;  %3841 = vmatpush3.bf16.msra.mxu1 %v3838_v60  ;;  %v1985_v10 = vld [vmem:[%s4893_s13 + $0x30] sm:$0xff]  ;;  %v2004_v60 = vld [vmem:[%s4893_s13 + $0xc8] sm:$0xff] }
 0x153   : > { %1608 = vmatpush1.bf16.msra.mxu0 %v4233_v62  ;;  %v2034_v62 = vld [vmem:[#allocation9 + $0x78] sm:$0xff] }
 0x154   : > { %v3842_v63 = vpack.c.bf16 %v2034_v62, %v2033_v61  ;;  %v2005_v61 = vld [vmem:[%s4893_s13 + $0xd0] sm:$0xff]  ;;  %v2006_v62 = vld [vmem:[%s4893_s13 + $0xd8] sm:$0xff] }
 0x156   : > { %1481 = vmatmul.mubr.bf16.gmra.mrb[32].mxu0 %v4186_v1  ;;  %v1979_v1 = vld [vmem:[%s4893_s13] sm:$0xff]  ;;  %3843 = vmatprep.subr.bf16.mxu1 %v3842_v63 }
 0x157   : > { %1488 = vmatprep.mubr.bf16.mxu0 %v4187_v2  ;;  %v4244_v2 = vld [vmem:[%s4880_s14 + $0x30] ss:$20 sps:$4 sm:$0xff]   ;;  %3845 = vmatpush3.bf16.msra.mxu1 %v3842_v63 }
 0x158   : > { %v2007_v63 = vld [vmem:[%s4893_s13 + $0xe0] sm:$0xff] }
 0x159   : > { %3515 = vmatmul.mubr.bf16.gmra.mrb[16].mxu1 %v4272_v11  ;;  %v1986_v11 = vld [vmem:[%s4893_s13 + $0x38] sm:$0xff] }
 0x15a   : > { %3518 = vmatprep.mubr.bf16.mxu1 %v4277_v16  ;;  %v1989_v16 = vld [vmem:[%s4893_s13 + $0x50] sm:$0xff] }
 0x15e   : > { %1489 = vmatmul.mubr.bf16.gmra.mrb[36].mxu0 %v4190_v3  ;;  %v4246_v3 = vld [vmem:[%s4880_s14 + $0x5c] ss:$20 sps:$4 sm:$0xff]  }
 0x15f   : > { %1496 = vmatprep.mubr.bf16.mxu0 %v4191_v4  ;;  %v1980_v4 = vld [vmem:[%s4893_s13 + $0x8] sm:$0xff] }
 0x161   : > { %3519 = vmatmul.mubr.bf16.gmra.mrb[20].mxu1 %v4280_v17  ;;  %v1990_v17 = vld [vmem:[%s4893_s13 + $0x58] sm:$0xff] }
 0x162   : > { %3522 = vmatprep.mubr.bf16.mxu1 %v4285_v22  ;;  %v1964_v22 = vld [vmem:[#allocation8 + $0x8] sm:$0xff] }
 0x166   : > { %1497 = vmatmul.mubr.bf16.gmra.mrb[40].mxu0 %v4193_v6  ;;  %v1983_v6 = vld [vmem:[%s4893_s13 + $0x20] sm:$0xff] }
 0x167   : > { %1504 = vmatprep.mubr.bf16.mxu0 %v4195_v7  ;;  %v4249_v7 = vld [vmem:[%s4880_s14 + $0x58] ss:$20 sps:$4 sm:$0xff]  }
 0x169   : > { %3523 = vmatmul.mubr.bf16.gmra.mrb[24].mxu1 %v4288_v23  ;;  %v1992_v23 = vld [vmem:[%s4893_s13 + $0x68] sm:$0xff] }
 0x16a   : > { %3526 = vmatprep.mubr.bf16.mxu1 %v4293_v33  ;;  %v3854_v33 = vpack.c.bf16 %v1968_v30, %v1967_v29  ;;  %v4292_v30 = vld [vmem:[%s4880_s14 + $0x210] ss:$20 sps:$4 sm:$0xff]  }
 0x16e   : > { %1505 = vmatmul.mubr.bf16.gmra.mrb[44].mxu0 %v4197_v8  ;;  %v4250_v8 = vld [vmem:[%s4880_s14 + $0x84] ss:$20 sps:$4 sm:$0xff]  }
 0x16f   : > { %1512 = vmatprep.mubr.bf16.mxu0 %v4199_v9  ;;  %v1984_v9 = vld [vmem:[%s4893_s13 + $0x28] sm:$0xff] }
 0x171   : > { %3527 = vmatmul.mubr.bf16.gmra.mrb[28].mxu1 %v4296_v35  ;;  %v1969_v35 = vld [vmem:[#allocation8 + $0x30] sm:$0xff] }
 0x172   : > { %3530 = vmatprep.mubr.bf16.mxu1 %v4300_v44  ;;  %v1999_v44 = vld [vmem:[%s4893_s13 + $0xa0] sm:$0xff] }
 0x176   : > { %1513 = vmatmul.mubr.bf16.gmra.mrb[48].mxu0 %v4201_v12  ;;  %v1987_v12 = vld [vmem:[%s4893_s13 + $0x40] sm:$0xff] }
 0x177   : > { %1520 = vmatprep.mubr.bf16.mxu0 %v4203_v13  ;;  %v4252_v13 = vld [vmem:[%s4880_s14 + $0x80] ss:$20 sps:$4 sm:$0xff]  }
 0x179   : > { %3531 = vmatmul.mubr.bf16.gmra.mrb[32].mxu1 %v4302_v49  ;;  %v4266_v49 = vld [vmem:[%s4880_s14 + $0x124] ss:$20 sps:$4 sm:$0xff]  }
 0x17a   : > { %3534 = vmatprep.mubr.bf16.mxu1 %v4305_v54  ;;  %v1976_v54 = vld [vmem:[#allocation8 + $0x68] sm:$0xff] }
 0x17b   : > { %v3870_v57 = vpack.c.bf16 %v1976_v54, %v1975_v53  ;;  %v4316_v54 = vld [vmem:[%s4880_s14 + $0x300] ss:$20 sps:$4 sm:$0xff]  }
 0x17e   : > { %1521 = vmatmul.mubr.bf16.gmra.mrb[52].mxu0 %v4205_v14  ;;  %v4254_v14 = vld [vmem:[%s4880_s14 + $0xac] ss:$20 sps:$4 sm:$0xff]  }
 0x17f   : > { %1528 = vmatprep.mubr.bf16.mxu0 %v4206_v15  ;;  %v1988_v15 = vld [vmem:[%s4893_s13 + $0x48] sm:$0xff] }
 0x181   : > { %3535 = vmatmul.mubr.bf16.gmra.mrb[36].mxu1 %v4307_v59  ;;  %v4270_v59 = vld [vmem:[%s4880_s14 + $0x14c] ss:$20 sps:$4 sm:$0xff]  }
 0x182   : > { %3570 = vmatprep.mubr.f32.mxu1 %v1979_v1  ;;  %v4273_v1 = vld [vmem:[%s4880_s14 + $0x148] ss:$20 sps:$4 sm:$0xff]  }
 0x186   : > { %1529 = vmatmul.mubr.bf16.gmra.mrb[56].mxu0 %v4209_v18  ;;  %v1991_v18 = vld [vmem:[%s4893_s13 + $0x60] sm:$0xff] }
 0x187   : > { %1536 = vmatprep.mubr.bf16.mxu0 %v4210_v19  ;;  %v4257_v19 = vld [vmem:[%s4880_s14 + $0xa8] ss:$20 sps:$4 sm:$0xff]  }
 0x189   : > { %3571 = vmatmul.mubr.f32.vlgmr.msra.gmra.mrb[40].mxu1 %v1980_v4  ;;  %v2009_v4 = vld [vmem:[%s4893_s13 + $0xf0] sm:$0xff] }
 0x18a   : > { %3573 = vmatprep.mubr.f32.mxu1 %v1981_v5  ;;  %v2010_v5 = vld [vmem:[%s4893_s13 + $0xf8] sm:$0xff] }
 0x18d   : > { %3574 = vmatmul.mubr.f32.gmra.mrb[42].mxu1 %v1982_v0  ;;  %v2011_v0 = vld [vmem:[%s4893_s13 + $0x100] sm:$0xff] }
 0x18e   : > { %1537 = vmatmul.mubr.bf16.gmra.mrb[60].mxu0 %v4212_v20  ;;  %3576 = vmatprep.mubr.f32.mxu1 %v1983_v6  ;;  %v4258_v20 = vld [vmem:[%s4880_s14 + $0xd4] ss:$20 sps:$4 sm:$0xff]   ;;  %v4276_v6 = vld [vmem:[%s4880_s14 + $0x170] ss:$20 sps:$4 sm:$0xff]  }
 0x18f   : > { %1544 = vmatprep.mubr.bf16.mxu0 %v4214_v21  ;;  %v1963_v21 = vld [vmem:[#allocation8] sm:$0xff] }
 0x191   : > { %3577 = vmatmul.mubr.f32.gmra.mrb[44].mxu1 %v1984_v9  ;;  %v2013_v9 = vld [vmem:[%s4893_s13 + $0x110] sm:$0xff] }
 0x192   : > { %3579 = vmatprep.mubr.f32.mxu1 %v1985_v10  ;;  %v2014_v10 = vld [vmem:[%s4893_s13 + $0x118] sm:$0xff] }
 0x195   : > { %3580 = vmatmul.mubr.f32.gmra.mrb[46].mxu1 %v1986_v11  ;;  %v2015_v11 = vld [vmem:[%s4893_s13 + $0x120] sm:$0xff] }
 0x196   : > { %1545 = vmatmul.mubr.bf16.gmra.mrb[64].mxu0 %v4217_v24  ;;  %3582 = vmatprep.mubr.f32.mxu1 %v1987_v12  ;;  %v3846_v24 = vpack.c.bf16 %v1964_v22, %v1963_v21  ;;  %v4281_v12 = vld [vmem:[%s4880_s14 + $0x198] ss:$20 sps:$4 sm:$0xff]   ;;  %v4284_v22 = vld [vmem:[%s4880_s14 + $0x1c0] ss:$20 sps:$4 sm:$0xff]  }
 0x197   : > { %1552 = vmatprep.mubr.bf16.mxu0 %v4220_v25  ;;  %v1965_v25 = vld [vmem:[#allocation8 + $0x10] sm:$0xff]  ;;  %v2018_v21 = vld [vmem:[%s4893_s13 + $0x138] sm:$0xff] }
 0x198   : > { %3847 = vmatprep.subr.bf16.mxu1 %v3846_v24 }
 0x199   : > { %3583 = vmatmul.mubr.f32.gmra.mrb[48].mxu1 %v1988_v15 }
 0x19a   : > { %3585 = vmatprep.mubr.f32.mxu1 %v1989_v16  ;;  %3849 = vmatpush3.bf16.msra.mxu1 %v3846_v24  ;;  %v1977_v16 = vld [vmem:[#allocation8 + $0x70] sm:$0xff]  ;;  %v4286_v24 = vld [vmem:[%s4880_s14 + $0x1ec] ss:$20 sps:$4 sm:$0xff]  }
 0x19d   : > { %3586 = vmatmul.mubr.f32.gmra.mrb[50].mxu1 %v1990_v17  ;;  %v1978_v17 = vld [vmem:[#allocation8 + $0x78] sm:$0xff] }
 0x19e   : > { %1553 = vmatmul.mubr.bf16.gmra.mrb[68].mxu0 %v4223_v26  ;;  %3588 = vmatprep.mubr.f32.mxu1 %v1991_v18  ;;  %v1993_v26 = vld [vmem:[%s4893_s13 + $0x70] sm:$0xff] }
 0x19f   : > { %1560 = vmatprep.mubr.bf16.mxu0 %v4226_v27  ;;  %v1966_v27 = vld [vmem:[#allocation8 + $0x18] sm:$0xff]  ;;  %v2017_v18 = vld [vmem:[%s4893_s13 + $0x130] sm:$0xff] }
 0x1a0   : > { %v3850_v28 = vpack.c.bf16 %v1966_v27, %v1965_v25  ;;  %v4290_v27 = vld [vmem:[%s4880_s14 + $0x214] ss:$20 sps:$4 sm:$0xff]  }
 0x1a1   : > { %3589 = vmatmul.mubr.f32.gmra.mrb[52].mxu1 %v1992_v23 }
 0x1a2   : > { %3591 = vmatprep.mubr.f32.mxu1 %v1993_v26  ;;  %3851 = vmatprep.subr.bf16.mxu1 %v3850_v28  ;;  %v4289_v26 = vld [vmem:[%s4880_s14 + $0x1e8] ss:$20 sps:$4 sm:$0xff]  }
 0x1a3   : > { %3853 = vmatpush3.bf16.msra.mxu1 %v3850_v28 }
 0x1a4   : > { %3855 = vmatprep.subr.bf16.mxu1 %v3854_v33 }
 0x1a5   : > { %3592 = vmatmul.mubr.f32.gmra.mrb[54].mxu1 %v1994_v31 }
 0x1a6   : > { %1561 = vmatmul.mubr.bf16.gmra.mrb[72].mxu0 %v4229_v36  ;;  %v1970_v36 = vld [vmem:[#allocation8 + $0x38] sm:$0xff]  ;;  %3594 = vmatprep.mubr.f32.mxu1 %v1995_v32 }
 0x1a7   : > { %1568 = vmatprep.mubr.bf16.mxu0 %v4231_v37  ;;  %v4262_v37 = vld [vmem:[%s4880_s14 + $0xfc] ss:$20 sps:$4 sm:$0xff]   ;;  %v3858_v40 = vpack.c.bf16 %v1970_v36, %v1969_v35  ;;  %3857 = vmatpush3.bf16.msra.mxu1 %v3854_v33  ;;  %v4298_v35 = vld [vmem:[%s4880_s14 + $0x264] ss:$20 sps:$4 sm:$0xff]  }
 0x1a8   : > { %v4294_v32 = vld [vmem:[%s4880_s14 + $0x23c] ss:$20 sps:$4 sm:$0xff]  }
 0x1a9   : > { %3595 = vmatmul.mubr.f32.gmra.mrb[56].mxu1 %v1996_v38  ;;  %3859 = vmatprep.subr.bf16.mxu1 %v3858_v40  ;;  %v4301_v38 = vld [vmem:[%s4880_s14 + $0x260] ss:$20 sps:$4 sm:$0xff]  }
 0x1aa   : > { %3597 = vmatprep.mubr.f32.mxu1 %v1997_v39 }
 0x1ab   : > { %3861 = vmatpush3.bf16.msra.mxu1 %v3858_v40  ;;  %v4303_v40 = vld [vmem:[%s4880_s14 + $0x28c] ss:$20 sps:$4 sm:$0xff]  }
 0x1ad   : > { %3598 = vmatmul.mubr.f32.gmra.mrb[58].mxu1 %v1998_v43  ;;  %v4308_v43 = vld [vmem:[%s4880_s14 + $0x2b4] ss:$20 sps:$4 sm:$0xff]  }
 0x1ae   : > { %1569 = vmatmul.mubr.bf16.gmra.mrb[76].mxu0 %v4235_v45  ;;  %v3862_v45 = vpack.c.bf16 %v1972_v42, %v1971_v41  ;;  %3600 = vmatprep.mubr.f32.mxu1 %v1999_v44  ;;  %v4306_v42 = vld [vmem:[%s4880_s14 + $0x288] ss:$20 sps:$4 sm:$0xff]  }
 0x1af   : > { %1609 = vmatprep.mubr.bf16.mxu0 %v4240_v46  ;;  %v4265_v46 = vld [vmem:[%s4880_s14 + $0xf8] ss:$20 sps:$4 sm:$0xff]  }
 0x1b0   : > { %3863 = vmatprep.subr.bf16.mxu1 %v3862_v45 }
 0x1b1   : > { %3601 = vmatmul.mubr.f32.gmra.mrb[60].mxu1 %v2000_v50  ;;  %v4313_v50 = vld [vmem:[%s4880_s14 + $0x2d8] ss:$20 sps:$4 sm:$0xff]  }
 0x1b2   : > { %3603 = vmatprep.mubr.f32.mxu1 %v2001_v51  ;;  %3865 = vmatpush3.bf16.msra.mxu1 %v3862_v45  ;;  %v4314_v51 = vld [vmem:[%s4880_s14 + $0x304] ss:$20 sps:$4 sm:$0xff]  }
 0x1b3   : > { %3867 = vmatprep.subr.bf16.mxu1 %v3866_v52 }
 0x1b6   : > { %1610 = vmatmul.mubr.bf16.vlgmr.msra.gmra.mrb[0].mxu0 %v4238_v55  ;;  %v2002_v55 = vld [vmem:[%s4893_s13 + $0xb8] sm:$0xff]  ;;  %3869 = vmatpush3.bf16.msra.mxu1 %v3866_v52 }
 0x1b7   : > { %1617 = vmatprep.mubr.bf16.mxu0 %v4242_v56  ;;  %v2003_v56 = vld [vmem:[%s4893_s13 + $0xc0] sm:$0xff]  ;;  %3604 = vmatmul.mubr.f32.gmra.mrb[62].mxu1 %v2002_v55 }
 0x1b8   : > { %3606 = vmatprep.mubr.f32.mxu1 %v2003_v56  ;;  %3871 = vmatprep.subr.bf16.mxu1 %v3870_v57 }
 0x1ba   : > { %3873 = vmatpush3.bf16.msra.mxu1 %v3870_v57 }
 0x1bb   : > { %3607 = vmatmul.mubr.f32.gmra.mrb[64].mxu1 %v2004_v60 }
 0x1bc   : > { %3609 = vmatprep.mubr.f32.mxu1 %v2005_v61 }
 0x1be   : > { %1618 = vmatmul.mubr.bf16.gmra.mrb[4].mxu0 %v4244_v2  ;;  %v4274_v2 = vld [vmem:[%s4880_s14 + $0x174] ss:$20 sps:$4 sm:$0xff]  }
 0x1bf   : > { %1625 = vmatprep.mubr.bf16.mxu0 %v4246_v3  ;;  %3610 = vmatmul.mubr.f32.gmra.mrb[66].mxu1 %v2006_v62  ;;  %v2008_v3 = vld [vmem:[%s4893_s13 + $0xe8] sm:$0xff] }
 0x1c0   : > { %3612 = vmatprep.mubr.f32.mxu1 %v2007_v63 }
 0x1c3   : > { %3613 = vmatmul.mubr.f32.gmra.mrb[68].mxu1 %v2008_v3 }
 0x1c4   : > { %3615 = vmatprep.mubr.f32.mxu1 %v2009_v4 }
 0x1c6   : > { %1626 = vmatmul.mubr.bf16.gmra.mrb[8].mxu0 %v4249_v7  ;;  %v4278_v7 = vld [vmem:[%s4880_s14 + $0x19c] ss:$20 sps:$4 sm:$0xff]  }
 0x1c7   : > { %1633 = vmatprep.mubr.bf16.mxu0 %v4250_v8  ;;  %3616 = vmatmul.mubr.f32.gmra.mrb[70].mxu1 %v2010_v5  ;;  %v2012_v8 = vld [vmem:[%s4893_s13 + $0x108] sm:$0xff] }
 0x1c8   : > { %3618 = vmatprep.mubr.f32.mxu1 %v2011_v0 }
 0x1cb   : > { %3619 = vmatmul.mubr.f32.gmra.mrb[72].mxu1 %v2012_v8 }
 0x1cc   : > { %3621 = vmatprep.mubr.f32.mxu1 %v2013_v9 }
 0x1ce   : > { %1634 = vmatmul.mubr.bf16.gmra.mrb[12].mxu0 %v4252_v13  ;;  %v4282_v13 = vld [vmem:[%s4880_s14 + $0x1c4] ss:$20 sps:$4 sm:$0xff]  }
 0x1cf   : > { %1641 = vmatprep.mubr.bf16.mxu0 %v4254_v14  ;;  %3622 = vmatmul.mubr.f32.gmra.mrb[74].mxu1 %v2014_v10  ;;  %v2016_v14 = vld [vmem:[%s4893_s13 + $0x128] sm:$0xff]  ;;  %v5060_v15 = vpop.f32.mrb[0].mxu1 }
 0x1d0   : > { %3624 = vmatprep.mubr.f32.mxu1 %v2015_v11 }
 0x1d3   : > { %3625 = vmatmul.mubr.f32.gmra.mrb[76].mxu1 %v2016_v14 }
 0x1d4   : > { %3627 = vmatprep.mubr.f32.mxu1 %v2017_v18 }
 0x1d6   : > { %1642 = vmatmul.mubr.bf16.gmra.mrb[16].mxu0 %v4257_v19  ;;  %v3874_v19 = vpack.c.bf16 %v1978_v17, %v1977_v16 }
 0x1d7   : > { %1649 = vmatprep.mubr.bf16.mxu0 %v4258_v20  ;;  %v5063_v20 = vpop.f32.mrb[1].mxu1  ;;  %3628 = vmatmul.mubr.f32.gmra.mrb[78].mxu1 %v2018_v21 }
 0x1d8   : > { %v5067_v23 = vpop.f32.mrb[2].mxu1  ;;  %3875 = vmatprep.subr.bf16.mxu1 %v3874_v19 }
 0x1d9   : > { %v5070_v25 = vpop.f32.mrb[3].mxu1  ;;  %3877 = vmatpush3.bf16.msra.mxu1 %v3874_v19 }
 0x1da   : > { %v5074_v28 = vpop.f32.mrb[4].mxu1 }
 0x1db   : > { %v5076_v29 = vpop.f32.mrb[5].mxu1 }
 0x1dc   : > { %v5079_v31 = vpop.f32.mrb[6].mxu1 }
 0x1dd   : > { %v5082_v33 = vpop.f32.mrb[7].mxu1 }
 0x1de   : > { %1650 = vmatmul.mubr.bf16.gmra.mrb[20].mxu0 %v4260_v34  ;;  %v4297_v34 = vld [vmem:[%s4880_s14 + $0x238] ss:$20 sps:$4 sm:$0xff]  }
 0x1df   : > { %1657 = vmatprep.mubr.bf16.mxu0 %v4262_v37  ;;  %v5086_v36 = vpop.f32.mrb[8].mxu1 }
 0x1e0   : > { %v5088_v37 = vpop.f32.mrb[9].mxu1 }
 0x1e1   : > { %v5091_v39 = vpop.f32.mrb[10].mxu1 }
 0x1e2   : > { %v5094_v41 = vpop.f32.mrb[11].mxu1 }
 0x1e6   : > { %1658 = vmatmul.mubr.bf16.gmra.mrb[24].mxu0 %v4265_v46  ;;  %v4310_v46 = vld [vmem:[%s4880_s14 + $0x2b0] ss:$20 sps:$4 sm:$0xff]  }
 0x1e7   : > { %1665 = vmatprep.mubr.bf16.mxu0 %v4266_v49 }
 0x1ee   : > { %1666 = vmatmul.mubr.bf16.gmra.mrb[28].mxu0 %v4268_v58 }
 0x1ef   : > { %1673 = vmatprep.mubr.bf16.mxu0 %v4270_v59 }
 0x1f6   : > { %1674 = vmatmul.mubr.bf16.gmra.mrb[32].mxu0 %v4273_v1 }
 0x1f7   : > { %1681 = vmatprep.mubr.bf16.mxu0 %v4274_v2 }
 0x1fe   : > { %1682 = vmatmul.mubr.bf16.gmra.mrb[36].mxu0 %v4276_v6 }
 0x1ff   : > { %1689 = vmatprep.mubr.bf16.mxu0 %v4278_v7 }
 0x206   : > { %1690 = vmatmul.mubr.bf16.gmra.mrb[40].mxu0 %v4281_v12 }
 0x207   : > { %1697 = vmatprep.mubr.bf16.mxu0 %v4282_v13 }
 0x20e   : > { %1698 = vmatmul.mubr.bf16.gmra.mrb[44].mxu0 %v4284_v22 }
 0x20f   : > { %1705 = vmatprep.mubr.bf16.mxu0 %v4286_v24 }
 0x216   : > { %1706 = vmatmul.mubr.bf16.gmra.mrb[48].mxu0 %v4289_v26 }
 0x217   : > { %1713 = vmatprep.mubr.bf16.mxu0 %v4290_v27 }
 0x21e   : > { %1714 = vmatmul.mubr.bf16.gmra.mrb[52].mxu0 %v4292_v30 }
 0x21f   : > { %1721 = vmatprep.mubr.bf16.mxu0 %v4294_v32 }
 0x224   : > { %v5098_v44 = vpop.f32.mrb[12].mxu1 }
 0x225   : > { %v5100_v45 = vpop.f32.mrb[13].mxu1 }
 0x226   : > { %1722 = vmatmul.mubr.bf16.gmra.mrb[56].mxu0 %v4297_v34  ;;  %v5103_v47 = vpop.f32.mrb[14].mxu1 }
 0x227   : > { %1729 = vmatprep.mubr.bf16.mxu0 %v4298_v35  ;;  %v5106_v49 = vpop.f32.mrb[15].mxu1 }
 0x22c   : > { %v5110_v52 = vpop.f32.mrb[16].mxu1 }
 0x22d   : > { %v5112_v53 = vpop.f32.mrb[17].mxu1 }
 0x22e   : > { %1730 = vmatmul.mubr.bf16.gmra.mrb[60].mxu0 %v4301_v38  ;;  %v5115_v55 = vpop.f32.mrb[18].mxu1 }
 0x22f   : > { %1737 = vmatprep.mubr.bf16.mxu0 %v4303_v40  ;;  %v5117_v56 = vpop.f32.mrb[19].mxu1 }
 0x234   : > { %v5119_v57 = vpop.f32.mrb[20].mxu1 }
 0x235   : > { %v5121_v58 = vpop.f32.mrb[21].mxu1 }
 0x236   : > { %1738 = vmatmul.mubr.bf16.gmra.mrb[64].mxu0 %v4306_v42  ;;  %v5123_v59 = vpop.f32.mrb[22].mxu1 }
 0x237   : > { %1745 = vmatprep.mubr.bf16.mxu0 %v4308_v43  ;;  %v5125_v60 = vpop.f32.mrb[23].mxu1 }
 0x23c   : > { %v5127_v61 = vpop.f32.mrb[24].mxu1 }
 0x23d   : > { %v5129_v62 = vpop.f32.mrb[25].mxu1 }
 0x23e   : > { %1746 = vmatmul.mubr.bf16.gmra.mrb[68].mxu0 %v4310_v46  ;;  %v5131_v63 = vpop.f32.mrb[26].mxu1 }
 0x23f   : > { %1753 = vmatprep.mubr.bf16.mxu0 %v4311_v48  ;;  %v5133_v1 = vpop.f32.mrb[27].mxu1  ;;  %v2653_v48 = vld [vmem:[#allocation11 + $0x8] sm:$0xff] }
 0x244   : > { %v5135_v2 = vpop.f32.mrb[28].mxu1 }
 0x245   : > { %v5137_v3 = vpop.f32.mrb[29].mxu1 }
 0x246   : > { %1754 = vmatmul.mubr.bf16.gmra.mrb[72].mxu0 %v4313_v50  ;;  %v5139_v4 = vpop.f32.mrb[30].mxu1  ;;  %v2654_v50 = vld [vmem:[#allocation11 + $0x10] sm:$0xff] }
 0x247   : > { %1761 = vmatprep.mubr.bf16.mxu0 %v4314_v51  ;;  %v5141_v5 = vpop.f32.mrb[31].mxu1 }
 0x24c   : > { %v5143_v0 = vpop.f32.mrb[32].mxu1 }
 0x24d   : > { %v5145_v7 = vpop.f32.mrb[33].mxu1 }
 0x24e   : > { %1762 = vmatmul.mubr.bf16.gmra.mrb[76].mxu0 %v4316_v54  ;;  %v5148_v10 = vpop.f32.mrb[34].mxu1  ;;  %v2655_v54 = vld [vmem:[#allocation11 + $0x18] sm:$0xff] }
 0x24f   : > { %v5150_v12 = vpop.f32.mrb[35].mxu1 }
 0x289   : > { %v1611_v6 = vpop.f32.mrb[0].mxu0 }
 0x28a   : > { %v1805_v8 = vadd.f32 %v5063_v20, %v1611_v6  ;;  %v1613_v9 = vpop.f32.mrb[1].mxu0  ;;  %v5155_v20 = vpop.f32.mrb[36].mxu1  ;;  %v3882_v6 = vpack.c.bf16 %v2655_v54, %v2654_v50 }
 0x28b   : > { %v1614_v11 = vpop.f32.mrb[2].mxu0  ;;  %v5157_v26 = vpop.f32.mrb[37].mxu1  ;;  %v2657_v9 = vld [vmem:[#allocation11 + $0x28] sm:$0xff] }
 0x28c   : > { %v1808_v13 = vadd.f32 %v5070_v25, %v1614_v11  ;;  %v1616_v14 = vpop.f32.mrb[3].mxu0  ;;  %3662 = vmatprep.mubr.f32.mxu1 %v1805_v8  ;;  %v5160_v30 = vpop.f32.mrb[38].mxu1  ;;  %v2656_v8 = vld [vmem:[#allocation11 + $0x20] sm:$0xff] }
 0x28d   : > { %v5162_v34 = vpop.f32.mrb[39].mxu1 }
 0x28e   : > { %3663 = vmatmul.mubr.f32.vlgmr.msra.gmra.mrb[40].mxu1 %v1808_v13 }
 0x291   : > { %v1619_v16 = vpop.f32.mrb[4].mxu0 }
 0x292   : > { %v1813_v17 = vadd.f32 %v5060_v15, %v1619_v16  ;;  %v1621_v18 = vpop.f32.mrb[5].mxu0  ;;  %v3886_v16 = vpack.c.bf16 %v2657_v9, %v2656_v8 }
 0x293   : > { %v1622_v19 = vpop.f32.mrb[6].mxu0  ;;  %v2659_v18 = vld [vmem:[#allocation11 + $0x38] sm:$0xff] }
 0x294   : > { %v1816_v21 = vadd.f32 %v5067_v23, %v1622_v19  ;;  %v1624_v22 = vpop.f32.mrb[7].mxu0  ;;  %3665 = vmatprep.mubr.f32.mxu1 %v1813_v17  ;;  %v2658_v17 = vld [vmem:[#allocation11 + $0x30] sm:$0xff] }
 0x295   : > { %v3890_v19 = vpack.c.bf16 %v2659_v18, %v2658_v17  ;;  %v2660_v22 = vld [vmem:[#allocation11 + $0x40] sm:$0xff] }
 0x296   : > { %3666 = vmatmul.mubr.f32.gmra.mrb[42].mxu1 %v1816_v21 }
 0x299   : > { %v1627_v24 = vpop.f32.mrb[8].mxu0 }
 0x29a   : > { %v1821_v25 = vadd.f32 %v5076_v29, %v1627_v24  ;;  %v1629_v27 = vpop.f32.mrb[9].mxu0  ;;  %v2652_v29 = vld [vmem:[#allocation11] sm:$0xff]  ;;  %v2661_v24 = vld [vmem:[#allocation11 + $0x48] sm:$0xff] }
 0x29b   : > { %v1630_v32 = vpop.f32.mrb[10].mxu0  ;;  %v3878_v51 = vpack.c.bf16 %v2653_v48, %v2652_v29 }
 0x29c   : > { %v1824_v15 = vadd.f32 %v5082_v33, %v1630_v32  ;;  %v1632_v35 = vpop.f32.mrb[11].mxu0  ;;  %3668 = vmatprep.mubr.f32.mxu1 %v1821_v25 }
 0x29d   : > { %3879 = vmatprep.subr.bf16.mxu1 %v3878_v51  ;;  %v2662_v35 = vld [vmem:[#allocation11 + $0x50] sm:$0xff] }
 0x29e   : > { %3669 = vmatmul.mubr.f32.gmra.mrb[44].mxu1 %v1824_v15  ;;  %v3894_v15 = vpack.c.bf16 %v2661_v24, %v2660_v22 }
 0x29f   : > { %3881 = vmatpush3.bf16.msra.mxu1 %v3878_v51 }
 0x2a0   : > { %3883 = vmatprep.subr.bf16.mxu1 %v3882_v6 }
 0x2a1   : > { %v1635_v23 = vpop.f32.mrb[12].mxu0 }
 0x2a2   : > { %v1829_v38 = vadd.f32 %v5074_v28, %v1635_v23  ;;  %v1637_v40 = vpop.f32.mrb[13].mxu0  ;;  %v2663_v23 = vld [vmem:[#allocation11 + $0x58] sm:$0xff] }
 0x2a3   : > { %v1638_v42 = vpop.f32.mrb[14].mxu0  ;;  %3885 = vmatpush3.bf16.msra.mxu1 %v3882_v6 }
 0x2a4   : > { %v1832_v43 = vadd.f32 %v5079_v31, %v1638_v42  ;;  %v1640_v46 = vpop.f32.mrb[15].mxu0  ;;  %3671 = vmatprep.mubr.f32.mxu1 %v1829_v38  ;;  %3887 = vmatprep.subr.bf16.mxu1 %v3886_v16  ;;  %v3898_v38 = vpack.c.bf16 %v2663_v23, %v2662_v35  ;;  %v2664_v42 = vld [vmem:[#allocation11 + $0x60] sm:$0xff] }
 0x2a6   : > { %3672 = vmatmul.mubr.f32.gmra.mrb[46].mxu1 %v1832_v43  ;;  %v2665_v43 = vld [vmem:[#allocation11 + $0x68] sm:$0xff] }
 0x2a7   : > { %3889 = vmatpush3.bf16.msra.mxu1 %v3886_v16  ;;  %v3902_v50 = vpack.c.bf16 %v2665_v43, %v2664_v42 }
 0x2a8   : > { %3891 = vmatprep.subr.bf16.mxu1 %v3890_v19 }
 0x2a9   : > { %v1643_v33 = vpop.f32.mrb[16].mxu0 }
 0x2aa   : > { %v1837_v11 = vadd.f32 %v5088_v37, %v1643_v33  ;;  %v1645_v28 = vpop.f32.mrb[17].mxu0 }
 0x2ab   : > { %v1646_v13 = vpop.f32.mrb[18].mxu0  ;;  %3893 = vmatpush3.bf16.msra.mxu1 %v3890_v19 }
 0x2ac   : > { %v1840_v31 = vadd.f32 %v5094_v41, %v1646_v13  ;;  %v1648_v14 = vpop.f32.mrb[19].mxu0  ;;  %3674 = vmatprep.mubr.f32.mxu1 %v1837_v11  ;;  %3895 = vmatprep.subr.bf16.mxu1 %v3894_v15 }
 0x2ae   : > { %3675 = vmatmul.mubr.f32.gmra.mrb[48].mxu1 %v1840_v31 }
 0x2af   : > { %3897 = vmatpush3.bf16.msra.mxu1 %v3894_v15 }
 0x2b0   : > { %3899 = vmatprep.subr.bf16.mxu1 %v3898_v38 }
 0x2b1   : > { %v1651_v21 = vpop.f32.mrb[20].mxu0 }
 0x2b2   : > { %v1845_v37 = vadd.f32 %v5086_v36, %v1651_v21  ;;  %v1653_v25 = vpop.f32.mrb[21].mxu0 }
 0x2b3   : > { %v1654_v27 = vpop.f32.mrb[22].mxu0  ;;  %3901 = vmatpush3.bf16.msra.mxu1 %v3898_v38  ;;  %v2666_v25 = vld [vmem:[#allocation11 + $0x70] sm:$0xff] }
 0x2b4   : > { %v1848_v32 = vadd.f32 %v5091_v39, %v1654_v27  ;;  %v1656_v41 = vpop.f32.mrb[23].mxu0  ;;  %3677 = vmatprep.mubr.f32.mxu1 %v1845_v37  ;;  %3903 = vmatprep.subr.bf16.mxu1 %v3902_v50 }
 0x2b6   : > { %3678 = vmatmul.mubr.f32.gmra.mrb[50].mxu1 %v1848_v32 }
 0x2b7   : > { %3905 = vmatpush3.bf16.msra.mxu1 %v3902_v50 }
 0x2b9   : > { %v1659_v40 = vpop.f32.mrb[24].mxu0 }
 0x2ba   : > { %v1853_v36 = vadd.f32 %v5100_v45, %v1659_v40  ;;  %v1661_v46 = vpop.f32.mrb[25].mxu0 }
 0x2bb   : > { %v1662_v29 = vpop.f32.mrb[26].mxu0 }
 0x2bc   : > { %v1856_v39 = vadd.f32 %v5106_v49, %v1662_v29  ;;  %v1664_v48 = vpop.f32.mrb[27].mxu0  ;;  %3680 = vmatprep.mubr.f32.mxu1 %v1853_v36 }
 0x2be   : > { %3681 = vmatmul.mubr.f32.gmra.mrb[52].mxu1 %v1856_v39 }
 0x2c1   : > { %v1667_v51 = vpop.f32.mrb[28].mxu0 }
 0x2c2   : > { %v1861_v54 = vadd.f32 %v5098_v44, %v1667_v51  ;;  %v1669_v6 = vpop.f32.mrb[29].mxu0 }
 0x2c3   : > { %v1670_v33 = vpop.f32.mrb[30].mxu0 }
 0x2c4   : > { %v1864_v45 = vadd.f32 %v5103_v47, %v1670_v33  ;;  %v1672_v8 = vpop.f32.mrb[31].mxu0  ;;  %3683 = vmatprep.mubr.f32.mxu1 %v1861_v54 }
 0x2c6   : > { %3684 = vmatmul.mubr.f32.gmra.mrb[54].mxu1 %v1864_v45 }
 0x2c9   : > { %v1675_v9 = vpop.f32.mrb[32].mxu0 }
 0x2ca   : > { %v1869_v49 = vadd.f32 %v5112_v53, %v1675_v9  ;;  %v1677_v11 = vpop.f32.mrb[33].mxu0 }
 0x2cb   : > { %v1678_v28 = vpop.f32.mrb[34].mxu0 }
 0x2cc   : > { %v1872_v13 = vadd.f32 %v5117_v56, %v1678_v28  ;;  %v1680_v31 = vpop.f32.mrb[35].mxu0  ;;  %3686 = vmatprep.mubr.f32.mxu1 %v1869_v49 }
 0x2ce   : > { %3687 = vmatmul.mubr.f32.gmra.mrb[56].mxu1 %v1872_v13 }
 0x2d1   : > { %v1683_v14 = vpop.f32.mrb[36].mxu0 }
 0x2d2   : > { %v1877_v44 = vadd.f32 %v5110_v52, %v1683_v14  ;;  %v1685_v16 = vpop.f32.mrb[37].mxu0  ;;  %v2667_v52 = vld [vmem:[#allocation11 + $0x78] sm:$0xff] }
 0x2d3   : > { %v1686_v17 = vpop.f32.mrb[38].mxu0 }
 0x2d4   : > { %v1880_v47 = vadd.f32 %v5115_v55, %v1686_v17  ;;  %v1688_v18 = vpop.f32.mrb[39].mxu0  ;;  %3689 = vmatprep.mubr.f32.mxu1 %v1877_v44  ;;  %v3906_v55 = vpack.c.bf16 %v2667_v52, %v2666_v25 }
 0x2d6   : > { %3690 = vmatmul.mubr.f32.gmra.mrb[58].mxu1 %v1880_v47  ;;  %3907 = vmatprep.subr.bf16.mxu1 %v3906_v55 }
 0x2d7   : > { %3909 = vmatpush3.bf16.msra.mxu1 %v3906_v55 }
 0x2d9   : > { %v1691_v19 = vpop.f32.mrb[40].mxu0 }
 0x2da   : > { %v1885_v53 = vadd.f32 %v5121_v58, %v1691_v19  ;;  %v1693_v21 = vpop.f32.mrb[41].mxu0 }
 0x2db   : > { %v1694_v22 = vpop.f32.mrb[42].mxu0 }
 0x2dc   : > { %v1888_v56 = vadd.f32 %v5125_v60, %v1694_v22  ;;  %v1696_v24 = vpop.f32.mrb[43].mxu0  ;;  %3692 = vmatprep.mubr.f32.mxu1 %v1885_v53 }
 0x2de   : > { %3693 = vmatmul.mubr.f32.gmra.mrb[60].mxu1 %v1888_v56 }
 0x2e1   : > { %v1699_v37 = vpop.f32.mrb[44].mxu0 }
 0x2e2   : > { %v1893_v27 = vadd.f32 %v5119_v57, %v1699_v37  ;;  %v1701_v32 = vpop.f32.mrb[45].mxu0 }
 0x2e3   : > { %v1702_v41 = vpop.f32.mrb[46].mxu0 }
 0x2e4   : > { %v1896_v15 = vadd.f32 %v5123_v59, %v1702_v41  ;;  %v1704_v35 = vpop.f32.mrb[47].mxu0  ;;  %3695 = vmatprep.mubr.f32.mxu1 %v1893_v27 }
 0x2e6   : > { %3696 = vmatmul.mubr.f32.gmra.mrb[62].mxu1 %v1896_v15 }
 0x2e9   : > { %v1707_v58 = vpop.f32.mrb[48].mxu0 }
 0x2ea   : > { %v1901_v60 = vadd.f32 %v5129_v62, %v1707_v58  ;;  %v1709_v23 = vpop.f32.mrb[49].mxu0 }
 0x2eb   : > { %v1710_v38 = vpop.f32.mrb[50].mxu0 }
 0x2ec   : > { %v1904_v40 = vadd.f32 %v5133_v1, %v1710_v38  ;;  %v1712_v42 = vpop.f32.mrb[51].mxu0  ;;  %3698 = vmatprep.mubr.f32.mxu1 %v1901_v60 }
 0x2ee   : > { %3699 = vmatmul.mubr.f32.gmra.mrb[64].mxu1 %v1904_v40 }
 0x2f1   : > { %v1715_v57 = vpop.f32.mrb[52].mxu0 }
 0x2f2   : > { %v1909_v43 = vadd.f32 %v5127_v61, %v1715_v57  ;;  %v1717_v36 = vpop.f32.mrb[53].mxu0 }
 0x2f3   : > { %v1718_v59 = vpop.f32.mrb[54].mxu0 }
 0x2f4   : > { %v1912_v46 = vadd.f32 %v5131_v63, %v1718_v59  ;;  %v1720_v29 = vpop.f32.mrb[55].mxu0  ;;  %3701 = vmatprep.mubr.f32.mxu1 %v1909_v43 }
 0x2f6   : > { %3702 = vmatmul.mubr.f32.gmra.mrb[66].mxu1 %v1912_v46 }
 0x2f9   : > { %v1723_v39 = vpop.f32.mrb[56].mxu0 }
 0x2fa   : > { %v1917_v62 = vadd.f32 %v5137_v3, %v1723_v39  ;;  %v1725_v48 = vpop.f32.mrb[57].mxu0 }
 0x2fb   : > { %v1726_v50 = vpop.f32.mrb[58].mxu0 }
 0x2fc   : > { %v1920_v1 = vadd.f32 %v5141_v5, %v1726_v50  ;;  %v1728_v51 = vpop.f32.mrb[59].mxu0  ;;  %3704 = vmatprep.mubr.f32.mxu1 %v1917_v62 }
 0x2fe   : > { %3705 = vmatmul.mubr.f32.gmra.mrb[68].mxu1 %v1920_v1 }
 0x301   : > { %v1731_v54 = vpop.f32.mrb[60].mxu0 }
 0x302   : > { %v1925_v61 = vadd.f32 %v5135_v2, %v1731_v54  ;;  %v1733_v6 = vpop.f32.mrb[61].mxu0 }
 0x303   : > { %v1734_v33 = vpop.f32.mrb[62].mxu0 }
 0x304   : > { %v1928_v63 = vadd.f32 %v5139_v4, %v1734_v33  ;;  %v1736_v45 = vpop.f32.mrb[63].mxu0  ;;  %3707 = vmatprep.mubr.f32.mxu1 %v1925_v61 }
 0x306   : > { %3708 = vmatmul.mubr.f32.gmra.mrb[70].mxu1 %v1928_v63 }
 0x309   : > { %v1739_v8 = vpop.f32.mrb[64].mxu0 }
 0x30a   : > { %v1933_v3 = vadd.f32 %v5145_v7, %v1739_v8  ;;  %v1741_v9 = vpop.f32.mrb[65].mxu0 }
 0x30b   : > { %v1742_v49 = vpop.f32.mrb[66].mxu0 }
 0x30c   : > { %v1936_v5 = vadd.f32 %v5150_v12, %v1742_v49  ;;  %v1744_v11 = vpop.f32.mrb[67].mxu0  ;;  %3710 = vmatprep.mubr.f32.mxu1 %v1933_v3 }
 0x30e   : > { %3711 = vmatmul.mubr.f32.gmra.mrb[72].mxu1 %v1936_v5 }
 0x311   : > { %v1747_v28 = vpop.f32.mrb[68].mxu0 }
 0x312   : > { %v1941_v2 = vadd.f32 %v5143_v0, %v1747_v28  ;;  %v1749_v13 = vpop.f32.mrb[69].mxu0 }
 0x313   : > { %v1750_v31 = vpop.f32.mrb[70].mxu0 }
 0x314   : > { %v1944_v4 = vadd.f32 %v5148_v10, %v1750_v31  ;;  %v1752_v14 = vpop.f32.mrb[71].mxu0  ;;  %3713 = vmatprep.mubr.f32.mxu1 %v1941_v2 }
 0x316   : > { %3714 = vmatmul.mubr.f32.gmra.mrb[74].mxu1 %v1944_v4 }
 0x319   : > { %v1755_v44 = vpop.f32.mrb[72].mxu0 }
 0x31a   : > { %v1949_v7 = vadd.f32 %v5157_v26, %v1755_v44  ;;  %v1757_v16 = vpop.f32.mrb[73].mxu0  ;;  %v5202_v26 = vld [vmem:[%s5389_s5] ss:$0 sm:$0xff] }
 0x31b   : > { %v1758_v17 = vpop.f32.mrb[74].mxu0 }
 0x31c   : > { %v1952_v12 = vadd.f32 %v5162_v34, %v1758_v17  ;;  %v1760_v47 = vpop.f32.mrb[75].mxu0  ;;  %3716 = vmatprep.mubr.f32.mxu1 %v1949_v7 }
 0x31e   : > { %3717 = vmatmul.mubr.f32.gmra.mrb[76].mxu1 %v1952_v12 }
 0x321   : > { %v1763_v18 = vpop.f32.mrb[76].mxu0 }
 0x322   : > { %v1957_v0 = vadd.f32 %v5155_v20, %v1763_v18  ;;  %v1765_v19 = vpop.f32.mrb[77].mxu0 }
 0x323   : > { %v1766_v53 = vpop.f32.mrb[78].mxu0 }
 0x324   : > { %v1960_v10 = vadd.f32 %v5160_v30, %v1766_v53  ;;  %v1768_v21 = vpop.f32.mrb[79].mxu0  ;;  %3719 = vmatprep.mubr.f32.mxu1 %v1957_v0 }
 0x326   : > { %3720 = vmatmul.mubr.f32.gmra.mrb[78].mxu1 %v1960_v10 }
 0x361   : > { %v3664_v22 = vpop.f32.mrb[40].mxu1 }
 0x362   : > { %v2573_v34 = vadd.f32 %v3664_v22, %v5202_v26  ;;  %v2366_v56 = vpop.f32.mrb[41].mxu1 }
 0x363   : > { %v2572_v24 = vadd.f32 %v5202_v26, %v2366_v56 }
 0x364   : > { %v2613_v20 = vmax.f32 %v2573_v34, 0.0 }
 0x365   : > { %v2612_v37 = vmax.f32 %v2572_v24, 0.0 }
 0x367   : > { %3754 = vmatprep.mubr.f32.mxu1 %v2612_v37 }
 0x368   : > { %3755 = vmatmul.mubr.f32.vlgmr.msra.gmra.mrb[80].mxu1 %v2613_v20 }
 0x369   : > { %v3667_v25 = vpop.f32.mrb[42].mxu1 }
 0x36a   : > { %v2575_v30 = vadd.f32 %v3667_v25, %v5202_v26  ;;  %v2376_v52 = vpop.f32.mrb[43].mxu1 }
 0x36b   : > { %v2574_v27 = vadd.f32 %v5202_v26, %v2376_v52 }
 0x36c   : > { %v2615_v55 = vmax.f32 %v2575_v30, 0.0 }
 0x36d   : > { %v2614_v32 = vmax.f32 %v2574_v27, 0.0 }
 0x36f   : > { %3757 = vmatprep.mubr.f32.mxu1 %v2614_v32 }
 0x370   : > { %3758 = vmatmul.mubr.f32.gmra.mrb[82].mxu1 %v2615_v55 }
 0x371   : > { %v3670_v41 = vpop.f32.mrb[44].mxu1 }
 0x372   : > { %v2577_v15 = vadd.f32 %v3670_v41, %v5202_v26  ;;  %v2386_v35 = vpop.f32.mrb[45].mxu1 }
 0x373   : > { %v2576_v58 = vadd.f32 %v5202_v26, %v2386_v35 }
 0x374   : > { %v2617_v23 = vmax.f32 %v2577_v15, 0.0 }
 0x375   : > { %v2616_v60 = vmax.f32 %v2576_v58, 0.0 }
 0x377   : > { %3760 = vmatprep.mubr.f32.mxu1 %v2616_v60 }
 0x378   : > { %3761 = vmatmul.mubr.f32.gmra.mrb[84].mxu1 %v2617_v23 }
 0x379   : > { %v3673_v38 = vpop.f32.mrb[46].mxu1 }
 0x37a   : > { %v2579_v40 = vadd.f32 %v3673_v38, %v5202_v26  ;;  %v2396_v42 = vpop.f32.mrb[47].mxu1 }
 0x37b   : > { %v2578_v57 = vadd.f32 %v5202_v26, %v2396_v42 }
 0x37c   : > { %v2619_v36 = vmax.f32 %v2579_v40, 0.0 }
 0x37d   : > { %v2618_v43 = vmax.f32 %v2578_v57, 0.0 }
 0x37f   : > { %3763 = vmatprep.mubr.f32.mxu1 %v2618_v43 }
 0x380   : > { %3764 = vmatmul.mubr.f32.gmra.mrb[86].mxu1 %v2619_v36 }
 0x381   : > { %v3676_v59 = vpop.f32.mrb[48].mxu1 }
 0x382   : > { %v2581_v46 = vadd.f32 %v3676_v59, %v5202_v26  ;;  %v2406_v29 = vpop.f32.mrb[49].mxu1 }
 0x383   : > { %v2580_v39 = vadd.f32 %v5202_v26, %v2406_v29 }
 0x384   : > { %v2621_v48 = vmax.f32 %v2581_v46, 0.0 }
 0x385   : > { %v2620_v62 = vmax.f32 %v2580_v39, 0.0 }
 0x387   : > { %3766 = vmatprep.mubr.f32.mxu1 %v2620_v62 }
 0x388   : > { %3767 = vmatmul.mubr.f32.gmra.mrb[88].mxu1 %v2621_v48 }
 0x389   : > { %v3679_v50 = vpop.f32.mrb[50].mxu1 }
 0x38a   : > { %v2583_v1 = vadd.f32 %v3679_v50, %v5202_v26  ;;  %v2416_v51 = vpop.f32.mrb[51].mxu1 }
 0x38b   : > { %v2582_v54 = vadd.f32 %v5202_v26, %v2416_v51 }
 0x38c   : > { %v2623_v6 = vmax.f32 %v2583_v1, 0.0 }
 0x38d   : > { %v2622_v61 = vmax.f32 %v2582_v54, 0.0 }
 0x38f   : > { %3769 = vmatprep.mubr.f32.mxu1 %v2622_v61 }
 0x390   : > { %3770 = vmatmul.mubr.f32.gmra.mrb[90].mxu1 %v2623_v6 }
 0x391   : > { %v3682_v33 = vpop.f32.mrb[52].mxu1 }
 0x392   : > { %v2585_v63 = vadd.f32 %v3682_v33, %v5202_v26  ;;  %v2426_v45 = vpop.f32.mrb[53].mxu1 }
 0x393   : > { %v2584_v8 = vadd.f32 %v5202_v26, %v2426_v45 }
 0x394   : > { %v2625_v9 = vmax.f32 %v2585_v63, 0.0 }
 0x395   : > { %v2624_v3 = vmax.f32 %v2584_v8, 0.0 }
 0x397   : > { %3772 = vmatprep.mubr.f32.mxu1 %v2624_v3 }
 0x398   : > { %3773 = vmatmul.mubr.f32.gmra.mrb[92].mxu1 %v2625_v9 }
 0x399   : > { %v3685_v49 = vpop.f32.mrb[54].mxu1 }
 0x39a   : > { %v2587_v5 = vadd.f32 %v3685_v49, %v5202_v26  ;;  %v2436_v11 = vpop.f32.mrb[55].mxu1 }
 0x39b   : > { %v2586_v28 = vadd.f32 %v5202_v26, %v2436_v11 }
 0x39c   : > { %v2627_v13 = vmax.f32 %v2587_v5, 0.0 }
 0x39d   : > { %v2626_v2 = vmax.f32 %v2586_v28, 0.0 }
 0x39f   : > { %3775 = vmatprep.mubr.f32.mxu1 %v2626_v2 }
 0x3a0   : > { %3776 = vmatmul.mubr.f32.gmra.mrb[94].mxu1 %v2627_v13 }
 0x3a1   : > { %v3688_v31 = vpop.f32.mrb[56].mxu1 }
 0x3a2   : > { %v2589_v4 = vadd.f32 %v3688_v31, %v5202_v26  ;;  %v2446_v14 = vpop.f32.mrb[57].mxu1 }
 0x3a3   : > { %v2588_v44 = vadd.f32 %v5202_v26, %v2446_v14 }
 0x3a4   : > { %v2629_v16 = vmax.f32 %v2589_v4, 0.0 }
 0x3a5   : > { %v2628_v7 = vmax.f32 %v2588_v44, 0.0 }
 0x3a7   : > { %3778 = vmatprep.mubr.f32.mxu1 %v2628_v7 }
 0x3a8   : > { %3779 = vmatmul.mubr.f32.gmra.mrb[96].mxu1 %v2629_v16 }
 0x3a9   : > { %v3691_v17 = vpop.f32.mrb[58].mxu1 }
 0x3aa   : > { %v2591_v12 = vadd.f32 %v3691_v17, %v5202_v26  ;;  %v2456_v47 = vpop.f32.mrb[59].mxu1 }
 0x3ab   : > { %v2590_v18 = vadd.f32 %v5202_v26, %v2456_v47 }
 0x3ac   : > { %v2631_v19 = vmax.f32 %v2591_v12, 0.0 }
 0x3ad   : > { %v2630_v0 = vmax.f32 %v2590_v18, 0.0  ;;  %v5247_v18 = vld [vmem:[%s5391_s7] ss:$0 sm:$0xff] }
 0x3af   : > { %3781 = vmatprep.mubr.f32.mxu1 %v2630_v0 }
 0x3b0   : > { %3782 = vmatmul.mubr.f32.gmra.mrb[98].mxu1 %v2631_v19 }
 0x3b1   : > { %v3694_v53 = vpop.f32.mrb[60].mxu1 }
 0x3b2   : > { %v2593_v10 = vadd.f32 %v3694_v53, %v5202_v26  ;;  %v2466_v21 = vpop.f32.mrb[61].mxu1 }
 0x3b3   : > { %v2592_v22 = vadd.f32 %v5202_v26, %v2466_v21 }
 0x3b4   : > { %v2633_v56 = vmax.f32 %v2593_v10, 0.0 }
 0x3b5   : > { %v2632_v34 = vmax.f32 %v2592_v22, 0.0 }
 0x3b7   : > { %3784 = vmatprep.mubr.f32.mxu1 %v2632_v34 }
 0x3b8   : > { %3785 = vmatmul.mubr.f32.gmra.mrb[100].mxu1 %v2633_v56 }
 0x3b9   : > { %v3697_v24 = vpop.f32.mrb[62].mxu1 }
 0x3ba   : > { %v2595_v37 = vadd.f32 %v3697_v24, %v5202_v26  ;;  %v2476_v20 = vpop.f32.mrb[63].mxu1 }
 0x3bb   : > { %v2594_v25 = vadd.f32 %v5202_v26, %v2476_v20 }
 0x3bc   : > { %v2635_v52 = vmax.f32 %v2595_v37, 0.0 }
 0x3bd   : > { %v2634_v30 = vmax.f32 %v2594_v25, 0.0 }
 0x3bf   : > { %3787 = vmatprep.mubr.f32.mxu1 %v2634_v30 }
 0x3c0   : > { %3788 = vmatmul.mubr.f32.gmra.mrb[102].mxu1 %v2635_v52 }
 0x3c1   : > { %v3700_v27 = vpop.f32.mrb[64].mxu1 }
 0x3c2   : > { %v2597_v32 = vadd.f32 %v3700_v27, %v5202_v26  ;;  %v2486_v55 = vpop.f32.mrb[65].mxu1 }
 0x3c3   : > { %v2596_v41 = vadd.f32 %v5202_v26, %v2486_v55 }
 0x3c4   : > { %v2637_v35 = vmax.f32 %v2597_v32, 0.0 }
 0x3c5   : > { %v2636_v15 = vmax.f32 %v2596_v41, 0.0 }
 0x3c7   : > { %3790 = vmatprep.mubr.f32.mxu1 %v2636_v15 }
 0x3c8   : > { %3791 = vmatmul.mubr.f32.gmra.mrb[104].mxu1 %v2637_v35 }
 0x3c9   : > { %v3703_v58 = vpop.f32.mrb[66].mxu1 }
 0x3ca   : > { %v2599_v60 = vadd.f32 %v3703_v58, %v5202_v26  ;;  %v2496_v23 = vpop.f32.mrb[67].mxu1 }
 0x3cb   : > { %v2598_v38 = vadd.f32 %v5202_v26, %v2496_v23 }
 0x3cc   : > { %v2639_v42 = vmax.f32 %v2599_v60, 0.0 }
 0x3cd   : > { %v2638_v40 = vmax.f32 %v2598_v38, 0.0 }
 0x3cf   : > { %3793 = vmatprep.mubr.f32.mxu1 %v2638_v40 }
 0x3d0   : > { %3794 = vmatmul.mubr.f32.gmra.mrb[106].mxu1 %v2639_v42 }
 0x3d1   : > { %v3706_v57 = vpop.f32.mrb[68].mxu1 }
 0x3d2   : > { %v2601_v43 = vadd.f32 %v3706_v57, %v5202_v26  ;;  %v2506_v36 = vpop.f32.mrb[69].mxu1 }
 0x3d3   : > { %v2600_v59 = vadd.f32 %v5202_v26, %v2506_v36 }
 0x3d4   : > { %v2641_v29 = vmax.f32 %v2601_v43, 0.0 }
 0x3d5   : > { %v2640_v46 = vmax.f32 %v2600_v59, 0.0 }
 0x3d7   : > { %3796 = vmatprep.mubr.f32.mxu1 %v2640_v46 }
 0x3d8   : > { %3797 = vmatmul.mubr.f32.gmra.mrb[108].mxu1 %v2641_v29 }
 0x3d9   : > { %v3709_v39 = vpop.f32.mrb[70].mxu1 }
 0x3da   : > { %v2603_v62 = vadd.f32 %v3709_v39, %v5202_v26  ;;  %v2516_v48 = vpop.f32.mrb[71].mxu1 }
 0x3db   : > { %v2602_v50 = vadd.f32 %v5202_v26, %v2516_v48 }
 0x3dc   : > { %v2643_v51 = vmax.f32 %v2603_v62, 0.0 }
 0x3dd   : > { %v2642_v1 = vmax.f32 %v2602_v50, 0.0 }
 0x3df   : > { %3799 = vmatprep.mubr.f32.mxu1 %v2642_v1 }
 0x3e0   : > { %3800 = vmatmul.mubr.f32.gmra.mrb[110].mxu1 %v2643_v51 }
 0x3e1   : > { %v3712_v54 = vpop.f32.mrb[72].mxu1 }
 0x3e2   : > { %v2605_v61 = vadd.f32 %v3712_v54, %v5202_v26  ;;  %v2526_v6 = vpop.f32.mrb[73].mxu1 }
 0x3e3   : > { %v2604_v33 = vadd.f32 %v5202_v26, %v2526_v6 }
 0x3e4   : > { %v2645_v45 = vmax.f32 %v2605_v61, 0.0 }
 0x3e5   : > { %v2644_v63 = vmax.f32 %v2604_v33, 0.0 }
 0x3e7   : > { %3802 = vmatprep.mubr.f32.mxu1 %v2644_v63 }
 0x3e8   : > { %3803 = vmatmul.mubr.f32.gmra.mrb[112].mxu1 %v2645_v45 }
 0x3e9   : > { %v3715_v8 = vpop.f32.mrb[74].mxu1 }
 0x3ea   : > { %v2607_v3 = vadd.f32 %v3715_v8, %v5202_v26  ;;  %v2536_v9 = vpop.f32.mrb[75].mxu1 }
 0x3eb   : > { %v2606_v49 = vadd.f32 %v5202_v26, %v2536_v9 }
 0x3ec   : > { %v2647_v11 = vmax.f32 %v2607_v3, 0.0 }
 0x3ed   : > { %v2646_v5 = vmax.f32 %v2606_v49, 0.0 }
 0x3ef   : > { %3805 = vmatprep.mubr.f32.mxu1 %v2646_v5 }
 0x3f0   : > { %3806 = vmatmul.mubr.f32.gmra.mrb[114].mxu1 %v2647_v11 }
 0x3f1   : > { %v3718_v28 = vpop.f32.mrb[76].mxu1 }
 0x3f2   : > { %v2609_v2 = vadd.f32 %v3718_v28, %v5202_v26  ;;  %v2546_v13 = vpop.f32.mrb[77].mxu1 }
 0x3f3   : > { %v2608_v31 = vadd.f32 %v5202_v26, %v2546_v13 }
 0x3f4   : > { %v2649_v14 = vmax.f32 %v2609_v2, 0.0 }
 0x3f5   : > { %v2648_v4 = vmax.f32 %v2608_v31, 0.0 }
 0x3f7   : > { %3808 = vmatprep.mubr.f32.mxu1 %v2648_v4 }
 0x3f8   : > { %3809 = vmatmul.mubr.f32.gmra.mrb[116].mxu1 %v2649_v14 }
 0x3f9   : > { %v3721_v44 = vpop.f32.mrb[78].mxu1 }
 0x3fa   : > { %v2611_v7 = vadd.f32 %v3721_v44, %v5202_v26  ;;  %v2556_v16 = vpop.f32.mrb[79].mxu1 }
 0x3fb   : > { %v2610_v17 = vadd.f32 %v5202_v26, %v2556_v16 }
 0x3fc   : > { %v2651_v47 = vmax.f32 %v2611_v7, 0.0 }
 0x3fd   : > { %v2650_v12 = vmax.f32 %v2610_v17, 0.0 }
 0x3ff   : > { %3811 = vmatprep.mubr.f32.mxu1 %v2650_v12 }
 0x400   : > { %3812 = vmatmul.mubr.f32.gmra.mrb[118].mxu1 %v2651_v47 }
 0x43b   : > { %v3756_v0 = vpop.f32.mrb[80].mxu1 }
 0x43c   : > { %v2747_v19 = vadd.f32 %v3756_v0, %v5247_v18  ;;  %v2741_v53 = vpop.f32.mrb[81].mxu1 }
 0x43d   : > { %v2742_v10 = vadd.f32 %v5247_v18, %v2741_v53 }
 0x43e   : > { %2941 = vst [vmem:[%s5253_s16 + $0x8] sm:$0xff] %v2747_v19 }
 0x43f   : > { %2940 = vst [vmem:[%s5253_s16] sm:$0xff] %v2742_v10 }
 0x443   : > { %v3759_v26 = vpop.f32.mrb[82].mxu1 }
 0x444   : > { %v2757_v21 = vadd.f32 %v3759_v26, %v5247_v18  ;;  %v2751_v22 = vpop.f32.mrb[83].mxu1 }
 0x445   : > { %v2752_v34 = vadd.f32 %v5247_v18, %v2751_v22 }
 0x446   : > { %2943 = vst [vmem:[%s5253_s16 + $0x18] sm:$0xff] %v2757_v21 }
 0x447   : > { %2942 = vst [vmem:[%s5253_s16 + $0x10] sm:$0xff] %v2752_v34 }
 0x44b   : > { %v3762_v56 = vpop.f32.mrb[84].mxu1 }
 0x44c   : > { %v2767_v24 = vadd.f32 %v3762_v56, %v5247_v18  ;;  %v2761_v37 = vpop.f32.mrb[85].mxu1 }
 0x44d   : > { %v2762_v20 = vadd.f32 %v5247_v18, %v2761_v37 }
 0x44e   : > { %2945 = vst [vmem:[%s5253_s16 + $0x28] sm:$0xff] %v2767_v24 }
 0x44f   : > { %2944 = vst [vmem:[%s5253_s16 + $0x20] sm:$0xff] %v2762_v20 }
 0x453   : > { %v3765_v25 = vpop.f32.mrb[86].mxu1 }
 0x454   : > { %v2777_v30 = vadd.f32 %v3765_v25, %v5247_v18  ;;  %v2771_v52 = vpop.f32.mrb[87].mxu1 }
 0x455   : > { %v2772_v27 = vadd.f32 %v5247_v18, %v2771_v52 }
 0x456   : > { %2947 = vst [vmem:[%s5253_s16 + $0x38] sm:$0xff] %v2777_v30 }
 0x457   : > { %2946 = vst [vmem:[%s5253_s16 + $0x30] sm:$0xff] %v2772_v27 }
 0x45b   : > { %v3768_v32 = vpop.f32.mrb[88].mxu1 }
 0x45c   : > { %v2787_v55 = vadd.f32 %v3768_v32, %v5247_v18  ;;  %v2781_v41 = vpop.f32.mrb[89].mxu1 }
 0x45d   : > { %v2782_v15 = vadd.f32 %v5247_v18, %v2781_v41 }
 0x45e   : > { %2949 = vst [vmem:[%s5253_s16 + $0x48] sm:$0xff] %v2787_v55 }
 0x45f   : > { %2948 = vst [vmem:[%s5253_s16 + $0x40] sm:$0xff] %v2782_v15 }
 0x463   : > { %v3771_v35 = vpop.f32.mrb[90].mxu1 }
 0x464   : > { %v2797_v58 = vadd.f32 %v3771_v35, %v5247_v18  ;;  %v2791_v60 = vpop.f32.mrb[91].mxu1 }
 0x465   : > { %v2792_v23 = vadd.f32 %v5247_v18, %v2791_v60 }
 0x466   : > { %2951 = vst [vmem:[%s5253_s16 + $0x58] sm:$0xff] %v2797_v58 }
 0x467   : > { %2950 = vst [vmem:[%s5253_s16 + $0x50] sm:$0xff] %v2792_v23 }
 0x46b   : > { %v3774_v38 = vpop.f32.mrb[92].mxu1 }
 0x46c   : > { %v2807_v40 = vadd.f32 %v3774_v38, %v5247_v18  ;;  %v2801_v42 = vpop.f32.mrb[93].mxu1 }
 0x46d   : > { %v2802_v57 = vadd.f32 %v5247_v18, %v2801_v42 }
 0x46e   : > { %2953 = vst [vmem:[%s5253_s16 + $0x68] sm:$0xff] %v2807_v40 }
 0x46f   : > { %2952 = vst [vmem:[%s5253_s16 + $0x60] sm:$0xff] %v2802_v57 }
 0x473   : > { %v3777_v43 = vpop.f32.mrb[94].mxu1 }
 0x474   : > { %v2817_v36 = vadd.f32 %v3777_v43, %v5247_v18  ;;  %v2811_v59 = vpop.f32.mrb[95].mxu1 }
 0x475   : > { %v2812_v46 = vadd.f32 %v5247_v18, %v2811_v59 }
 0x476   : > { %2955 = vst [vmem:[%s5253_s16 + $0x78] sm:$0xff] %v2817_v36 }
 0x477   : > { %2954 = vst [vmem:[%s5253_s16 + $0x70] sm:$0xff] %v2812_v46 }
 0x47b   : > { %v3780_v29 = vpop.f32.mrb[96].mxu1 }
 0x47c   : > { %v2827_v39 = vadd.f32 %v3780_v29, %v5247_v18  ;;  %v2821_v62 = vpop.f32.mrb[97].mxu1 }
 0x47d   : > { %v2822_v48 = vadd.f32 %v5247_v18, %v2821_v62 }
 0x47e   : > { %2957 = vst [vmem:[%s5253_s16 + $0x88] sm:$0xff] %v2827_v39 }
 0x47f   : > { %2956 = vst [vmem:[%s5253_s16 + $0x80] sm:$0xff] %v2822_v48 }
 0x483   : > { %v3783_v50 = vpop.f32.mrb[98].mxu1 }
 0x484   : > { %v2837_v1 = vadd.f32 %v3783_v50, %v5247_v18  ;;  %v2831_v51 = vpop.f32.mrb[99].mxu1 }
 0x485   : > { %v2832_v54 = vadd.f32 %v5247_v18, %v2831_v51 }
 0x486   : > { %2959 = vst [vmem:[%s5253_s16 + $0x98] sm:$0xff] %v2837_v1 }
 0x487   : > { %2958 = vst [vmem:[%s5253_s16 + $0x90] sm:$0xff] %v2832_v54 }
 0x48b   : > { %v3786_v61 = vpop.f32.mrb[100].mxu1 }
 0x48c   : > { %v2847_v6 = vadd.f32 %v3786_v61, %v5247_v18  ;;  %v2841_v33 = vpop.f32.mrb[101].mxu1 }
 0x48d   : > { %v2842_v63 = vadd.f32 %v5247_v18, %v2841_v33 }
 0x48e   : > { %2961 = vst [vmem:[%s5253_s16 + $0xa8] sm:$0xff] %v2847_v6 }
 0x48f   : > { %2960 = vst [vmem:[%s5253_s16 + $0xa0] sm:$0xff] %v2842_v63 }
 0x493   : > { %v3789_v45 = vpop.f32.mrb[102].mxu1 }
 0x494   : > { %v2857_v8 = vadd.f32 %v3789_v45, %v5247_v18  ;;  %v2851_v3 = vpop.f32.mrb[103].mxu1 }
 0x495   : > { %v2852_v9 = vadd.f32 %v5247_v18, %v2851_v3 }
 0x496   : > { %2963 = vst [vmem:[%s5253_s16 + $0xb8] sm:$0xff] %v2857_v8 }
 0x497   : > { %2962 = vst [vmem:[%s5253_s16 + $0xb0] sm:$0xff] %v2852_v9 }
 0x49b   : > { %v3792_v49 = vpop.f32.mrb[104].mxu1 }
 0x49c   : > { %v2867_v5 = vadd.f32 %v3792_v49, %v5247_v18  ;;  %v2861_v11 = vpop.f32.mrb[105].mxu1 }
 0x49d   : > { %v2862_v28 = vadd.f32 %v5247_v18, %v2861_v11 }
 0x49e   : > { %2965 = vst [vmem:[%s5253_s16 + $0xc8] sm:$0xff] %v2867_v5 }
 0x49f   : > { %2964 = vst [vmem:[%s5253_s16 + $0xc0] sm:$0xff] %v2862_v28 }
 0x4a3   : > { %v3795_v2 = vpop.f32.mrb[106].mxu1 }
 0x4a4   : > { %v2877_v13 = vadd.f32 %v3795_v2, %v5247_v18  ;;  %v2871_v31 = vpop.f32.mrb[107].mxu1 }
 0x4a5   : > { %v2872_v4 = vadd.f32 %v5247_v18, %v2871_v31 }
 0x4a6   : > { %2967 = vst [vmem:[%s5253_s16 + $0xd8] sm:$0xff] %v2877_v13 }
 0x4a7   : > { %2966 = vst [vmem:[%s5253_s16 + $0xd0] sm:$0xff] %v2872_v4 }
 0x4ab   : > { %v3798_v14 = vpop.f32.mrb[108].mxu1 }
 0x4ac   : > { %v2887_v44 = vadd.f32 %v3798_v14, %v5247_v18  ;;  %v2881_v7 = vpop.f32.mrb[109].mxu1 }
 0x4ad   : > { %v2882_v16 = vadd.f32 %v5247_v18, %v2881_v7 }
 0x4ae   : > { %2969 = vst [vmem:[%s5253_s16 + $0xe8] sm:$0xff] %v2887_v44 }
 0x4af   : > { %2968 = vst [vmem:[%s5253_s16 + $0xe0] sm:$0xff] %v2882_v16 }
 0x4b3   : > { %v3801_v17 = vpop.f32.mrb[110].mxu1 }
 0x4b4   : > { %v2897_v12 = vadd.f32 %v3801_v17, %v5247_v18  ;;  %v2891_v47 = vpop.f32.mrb[111].mxu1 }
 0x4b5   : > { %v2892_v0 = vadd.f32 %v5247_v18, %v2891_v47 }
 0x4b6   : > { %2971 = vst [vmem:[%s5253_s16 + $0xf8] sm:$0xff] %v2897_v12 }
 0x4b7   : > { %2970 = vst [vmem:[%s5253_s16 + $0xf0] sm:$0xff] %v2892_v0 }
 0x4bb   : > { %v3804_v19 = vpop.f32.mrb[112].mxu1 }
 0x4bc   : > { %v2907_v53 = vadd.f32 %v3804_v19, %v5247_v18  ;;  %v2901_v10 = vpop.f32.mrb[113].mxu1 }
 0x4bd   : > { %v2902_v26 = vadd.f32 %v5247_v18, %v2901_v10 }
 0x4be   : > { %2973 = vst [vmem:[%s5253_s16 + $0x108] sm:$0xff] %v2907_v53 }
 0x4bf   : > { %2972 = vst [vmem:[%s5253_s16 + $0x100] sm:$0xff] %v2902_v26 }
 0x4c3   : > { %v3807_v21 = vpop.f32.mrb[114].mxu1 }
 0x4c4   : > { %v2917_v22 = vadd.f32 %v3807_v21, %v5247_v18  ;;  %v2911_v34 = vpop.f32.mrb[115].mxu1 }
 0x4c5   : > { %v2912_v56 = vadd.f32 %v5247_v18, %v2911_v34 }
 0x4c6   : > { %2975 = vst [vmem:[%s5253_s16 + $0x118] sm:$0xff] %v2917_v22 }
 0x4c7   : > { %2974 = vst [vmem:[%s5253_s16 + $0x110] sm:$0xff] %v2912_v56 }
 0x4cb   : > { %v3810_v24 = vpop.f32.mrb[116].mxu1 }
 0x4cc   : > { %v2927_v37 = vadd.f32 %v3810_v24, %v5247_v18  ;;  %v2921_v20 = vpop.f32.mrb[117].mxu1 }
 0x4cd   : > { %v2922_v25 = vadd.f32 %v5247_v18, %v2921_v20 }
 0x4ce   : > { %2977 = vst [vmem:[%s5253_s16 + $0x128] sm:$0xff] %v2927_v37 }
 0x4cf   : > { %2976 = vst [vmem:[%s5253_s16 + $0x120] sm:$0xff] %v2922_v25 }
 0x4d3   : > { %v3813_v30 = vpop.f32.mrb[118].mxu1 }
 0x4d4   : > { %v2937_v52 = vadd.f32 %v3813_v30, %v5247_v18  ;;  %v2931_v27 = vpop.f32.mrb[119].mxu1 }
 0x4d5   : > { %v2932_v32 = vadd.f32 %v5247_v18, %v2931_v27 }
 0x4d6   : > { %2979 = vst [vmem:[%s5253_s16 + $0x138] sm:$0xff] %v2937_v52 }
 0x4d7   : > { %2978 = vst [vmem:[%s5253_s16 + $0x130] sm:$0xff] %v2932_v32 }
 0x4d8   : > { %4502 = shalt.err (!%p4499_p8)
}
 0x4d9   : > { %s4503_s8 = scalar_lea.hbm %s5335_s26, 5120  ;;  %s4507_s14 = scalar_lea.hbm %s5446_s22, 10240 }
 0x4da   : > { %p4504_p0 = scmp.ne.s32.totalorder %s5335_s26, %s4503_s8  ;;  %p4508_p7 = scmp.lt.u32.totalorder %s5335_s26, %s5446_s22 }
 0x4db   : > { %p4509_p2 = scmp.lt.u32.totalorder %s4507_s14, %s4503_s8  ;;  %p4511_p4 = scmp.lt.u32.totalorder %s4503_s8, %s5335_s26 }
 0x4dc   : > { %p4505_p10 = pnand %p4504_p0, %p5447_p13 }
 0x4dd   : > { %p4510_p1 = por %p4509_p2, %p4508_p7 }
 0x4de   : > { %p4506_p3 = pneg %p4505_p10 }
 0x4df   : > { %p4512_p5 = por %p4511_p4, %p4510_p1 }
 0x4e1   : > { %p4513_p12 = pnand %p4512_p5, %p4506_p3 }
 0x4e3   : > { %4516 = shalt.err (!%p4513_p12)
}
 0x4e4   : > { %s4587_s11 = smov 128   ;;  %s4588_s29 = smov 8  }
 0x4e5   : > { %4055 = dma.vmem_to_hbm [thread:$0]  (%p5447_p13), %s5337_s0, 5120, %s5335_s26, %s2981_s9, %s4587_s11, %s4587_s11, %s4588_s29  }
 0x4e6 PF: > { %s5448_s20 = sld [smem:[#allocation19_spill]]  ;;  %s5449_s23 = sld [smem:[#allocation21_spill]] }
 0x4e7   : > { %p5451_p6 = scmp.ge.s32.totalorder %s4571_s30, 2 }
 0x4ec   : > { %s3009_s16 = sand.u32 1, %s5448_s20   ;;  %p5450_p11 = scmp.ne.s32.totalorder %s5449_s23, 0 }
 0x4ed   : > { %s3010_s18 = scalar_lea.sflag [#allocation4], %s3009_s16 }
 0x4ee   : > { %p4078_p9 = pnand %p5451_p6, %p5450_p11 }
 0x4f0   : > { %4554 = dma.done.wait (!%p4078_p9), %s3010_s18, 5120  }
 0x4f1   : > { %4556 = vsyncadd (!%p4078_p9), %s3010_s18, 4294962176  ;;  %s5452_s30 = sld [smem:[#allocation22_spill]]  ;;  %s5453_s10 = sld [smem:[#allocation20_spill]] }
 0x4f2   : > { %s5454_s29 = sld [smem:[#allocation23_spill]]  ;;  %s5455_s27 = smov %s4563_s28 }
 0x4f7   : > { %p23_p8 = scmp.ge.s32.totalorder %s5452_s30, 4   ;;  %s5456_s28 = smov %s5453_s10 }
 0x4f9   :  { %25 = sbr.rel (!%p23_p8) target bundleno = 12 (0xc), region = 124 }
 0x500   :  { %3015 = vsyncpa [#allocation3], 1 }
 0x501   :  { %3017 = vsyncpa [#allocation3 + $0x1], 1 }
 0x502   :  { %3018 = vsyncpa [#allocation6], 1 }
 0x503   :  { %3019 = vsyncpa [#allocation10], 1 }
 0x504   :  { %3020 = vsyncpa [#allocation4], 1 }
 0x505   :  { %3022 = vsyncpa [#allocation4 + $0x1], 1 }

</bundles_post_ra>
